<compile_context>
chip_gen: v6e
topology: v6e:2x2x1
jax: 0.10.0
libtpu: 0.0.40
codegen_flags: <defaults>
</compile_context>

<pallas_src>
import functools

import jax
import jax.numpy as jnp
from jax.experimental import pallas as pl
from jax.experimental.pallas import tpu as pltpu


def residual_block_kernel(x_ref, w1_ref, b1_ref, w2_ref, b2_ref,
                          w3_ref, b3_ref, o_ref):
    x = x_ref[...]                                          # (bt, C) f32

    # out = relu(fc1(x))
    h = jnp.dot(x.astype(jnp.bfloat16), w1_ref[...],
                preferred_element_type=jnp.float32) + b1_ref[...]
    h = jnp.maximum(h, 0.0)

    # out = relu(relu(fc2(out)))  (second relu is idempotent)
    h = jnp.dot(h.astype(jnp.bfloat16), w2_ref[...],
                preferred_element_type=jnp.float32) + b2_ref[...]
    h = jnp.maximum(h, 0.0)

    # out = relu(fc3(out))
    h = jnp.dot(h.astype(jnp.bfloat16), w3_ref[...],
                preferred_element_type=jnp.float32) + b3_ref[...]
    h = jnp.maximum(h, 0.0)

    # out = relu(out + residual)  (residual add in f32)
    o_ref[...] = jnp.maximum(h + x, 0.0)


@functools.partial(jax.jit, static_argnames=("block_b",))
def residual_block(x, w1, b1, w2, b2, w3, b3, *, block_b=128):
    B, C = x.shape
    bt = block_b if B % block_b == 0 else B     # fall back to one full step
    grid = (B // bt,)

    row_spec = pl.BlockSpec((bt, C), lambda i: (i, 0))            # x / out tiles
    pinned = lambda r, c: pl.BlockSpec((r, c), lambda i: (0, 0))  # VMEM-resident

    # TODO(synk): for large C (>~2K) the all-resident bf16 weights exceed
    # v7x's 64 MiB VMEM; switch to a K/N-tiled grid with an f32 accumulator.
    return pl.pallas_call(
        residual_block_kernel,
        out_shape=jax.ShapeDtypeStruct((B, C), jnp.float32),
        grid=grid,
        in_specs=[
            row_spec,          # x
            pinned(C, C),      # w1 (C_in, C_out), bf16
            pinned(1, C),      # b1
            pinned(C, C),      # w2
            pinned(1, C),      # b2
            pinned(C, C),      # w3
            pinned(1, C),      # b3
        ],
        out_specs=row_spec,
        input_output_aliases={0: 0},            # reuse x's HBM buffer
        compiler_params=pltpu.CompilerParams(
            dimension_semantics=("parallel",)),
    )(x, w1, b1, w2, b2, w3, b3)


def reference(x, w1, b1, w2, b2, w3, b3):
    # Same bf16-input / f32-accumulate math as the kernel.
    def linear(a, w, b):
        return jnp.dot(a.astype(jnp.bfloat16), w,
                       preferred_element_type=jnp.float32) + b
    h = jnp.maximum(linear(x, w1, b1), 0.0)
    h = jnp.maximum(linear(h, w2, b2), 0.0)   # second relu is idempotent
    h = jnp.maximum(linear(h, w3, b3), 0.0)
    return jnp.maximum(h + x, 0.0)


if __name__ == "__main__":
    C = 378        # module default in_channels == out_channels (residual-valid)
    B = 512        # 4 grid steps of 128 rows -> pipelined, MXU-filling tiles

    key = jax.random.PRNGKey(0)
    kx, k1, k2, k3, kb1, kb2, kb3 = jax.random.split(key, 7)

    scale = 1.0 / jnp.sqrt(C)  # ~ PyTorch Linear default init scale
    x = jax.random.normal(kx, (B, C), dtype=jnp.float32)
    w1 = jax.random.uniform(k1, (C, C), jnp.float32, -scale, scale).astype(jnp.bfloat16)
    w2 = jax.random.uniform(k2, (C, C), jnp.float32, -scale, scale).astype(jnp.bfloat16)
    w3 = jax.random.uniform(k3, (C, C), jnp.float32, -scale, scale).astype(jnp.bfloat16)
    b1 = jax.random.uniform(kb1, (1, C), jnp.float32, -scale, scale)
    b2 = jax.random.uniform(kb2, (1, C), jnp.float32, -scale, scale)
    b3 = jax.random.uniform(kb3, (1, C), jnp.float32, -scale, scale)

    ref = reference(x, w1, b1, w2, b2, w3, b3)

    out = residual_block(x, w1, b1, w2, b2, w3, b3)
    out = jax.block_until_ready(out)

    assert out.shape == (B, C)
    assert jnp.allclose(out, ref, atol=1e-2, rtol=1e-2), (
        "max abs err", float(jnp.max(jnp.abs(out - ref))))

    print("KERNEL_OK")
</pallas_src>

<mosaic_0001>
module attributes {stable_mosaic.version = 11 : i64} {
  func.func @residual_block_kernel(%arg0: i32, %arg1: memref<128x378xf32, #tpu.memory_space<vmem>>, %arg2: memref<378x378xbf16, #tpu.memory_space<vmem>>, %arg3: memref<1x378xf32, #tpu.memory_space<vmem>>, %arg4: memref<378x378xbf16, #tpu.memory_space<vmem>>, %arg5: memref<1x378xf32, #tpu.memory_space<vmem>>, %arg6: memref<378x378xbf16, #tpu.memory_space<vmem>>, %arg7: memref<1x378xf32, #tpu.memory_space<vmem>>, %arg8: memref<128x378xf32, #tpu.memory_space<vmem>>) attributes {dimension_semantics = [#tpu.dimension_semantics<parallel>], iteration_bounds = array<i64: 4>, scalar_prefetch = 0 : i64, scratch_operands = 0 : i64, tpu.core_type = #tpu.core_type<tc>, window_params = [{transform_indices = @transform_0, window_bounds = array<i64: 128, 378>}, {pipeline_mode = #tpu.pipeline_mode<synchronous>, transform_indices = @transform_1, window_bounds = array<i64: 378, 378>}, {pipeline_mode = #tpu.pipeline_mode<synchronous>, transform_indices = @transform_2, window_bounds = array<i64: 1, 378>}, {pipeline_mode = #tpu.pipeline_mode<synchronous>, transform_indices = @transform_3, window_bounds = array<i64: 378, 378>}, {pipeline_mode = #tpu.pipeline_mode<synchronous>, transform_indices = @transform_4, window_bounds = array<i64: 1, 378>}, {pipeline_mode = #tpu.pipeline_mode<synchronous>, transform_indices = @transform_5, window_bounds = array<i64: 378, 378>}, {pipeline_mode = #tpu.pipeline_mode<synchronous>, transform_indices = @transform_6, window_bounds = array<i64: 1, 378>}, {transform_indices = @transform_7, window_bounds = array<i64: 128, 378>}]} {
    %c0 = arith.constant 0 : index
    %c0_0 = arith.constant 0 : index
    %0 = vector.load %arg1[%c0, %c0_0] : memref<128x378xf32, #tpu.memory_space<vmem>>, vector<128x378xf32>
    %1 = arith.truncf %0 : vector<128x378xf32> to vector<128x378xbf16>
    %c0_1 = arith.constant 0 : index
    %c0_2 = arith.constant 0 : index
    %2 = vector.load %arg2[%c0_1, %c0_2] : memref<378x378xbf16, #tpu.memory_space<vmem>>, vector<378x378xbf16>
    %cst = arith.constant dense<0.000000e+00> : vector<128x378xf32>
    %3 = tpu.matmul %1, %2, %cst {dimension_numbers = #tpu.dot_dimension_numbers<[1], [0], [0], [1], [0, 0, 1, 1], [], []>} : vector<128x378xbf16>, vector<378x378xbf16>, vector<128x378xf32> -> vector<128x378xf32>
    %c0_3 = arith.constant 0 : index
    %c0_4 = arith.constant 0 : index
    %4 = vector.load %arg3[%c0_3, %c0_4] : memref<1x378xf32, #tpu.memory_space<vmem>>, vector<1x378xf32>
    %5 = vector.broadcast %4 : vector<1x378xf32> to vector<128x378xf32>
    %6 = arith.addf %3, %5 : vector<128x378xf32>
    %cst_5 = arith.constant 0.000000e+00 : f32
    %7 = vector.broadcast %cst_5 : f32 to vector<128x378xf32>
    %8 = arith.maximumf %6, %7 : vector<128x378xf32>
    %9 = arith.truncf %8 : vector<128x378xf32> to vector<128x378xbf16>
    %c0_6 = arith.constant 0 : index
    %c0_7 = arith.constant 0 : index
    %10 = vector.load %arg4[%c0_6, %c0_7] : memref<378x378xbf16, #tpu.memory_space<vmem>>, vector<378x378xbf16>
    %cst_8 = arith.constant dense<0.000000e+00> : vector<128x378xf32>
    %11 = tpu.matmul %9, %10, %cst_8 {dimension_numbers = #tpu.dot_dimension_numbers<[1], [0], [0], [1], [0, 0, 1, 1], [], []>} : vector<128x378xbf16>, vector<378x378xbf16>, vector<128x378xf32> -> vector<128x378xf32>
    %c0_9 = arith.constant 0 : index
    %c0_10 = arith.constant 0 : index
    %12 = vector.load %arg5[%c0_9, %c0_10] : memref<1x378xf32, #tpu.memory_space<vmem>>, vector<1x378xf32>
    %13 = vector.broadcast %12 : vector<1x378xf32> to vector<128x378xf32>
    %14 = arith.addf %11, %13 : vector<128x378xf32>
    %cst_11 = arith.constant 0.000000e+00 : f32
    %15 = vector.broadcast %cst_11 : f32 to vector<128x378xf32>
    %16 = arith.maximumf %14, %15 : vector<128x378xf32>
    %17 = arith.truncf %16 : vector<128x378xf32> to vector<128x378xbf16>
    %c0_12 = arith.constant 0 : index
    %c0_13 = arith.constant 0 : index
    %18 = vector.load %arg6[%c0_12, %c0_13] : memref<378x378xbf16, #tpu.memory_space<vmem>>, vector<378x378xbf16>
    %cst_14 = arith.constant dense<0.000000e+00> : vector<128x378xf32>
    %19 = tpu.matmul %17, %18, %cst_14 {dimension_numbers = #tpu.dot_dimension_numbers<[1], [0], [0], [1], [0, 0, 1, 1], [], []>} : vector<128x378xbf16>, vector<378x378xbf16>, vector<128x378xf32> -> vector<128x378xf32>
    %c0_15 = arith.constant 0 : index
    %c0_16 = arith.constant 0 : index
    %20 = vector.load %arg7[%c0_15, %c0_16] : memref<1x378xf32, #tpu.memory_space<vmem>>, vector<1x378xf32>
    %21 = vector.broadcast %20 : vector<1x378xf32> to vector<128x378xf32>
    %22 = arith.addf %19, %21 : vector<128x378xf32>
    %cst_17 = arith.constant 0.000000e+00 : f32
    %23 = vector.broadcast %cst_17 : f32 to vector<128x378xf32>
    %24 = arith.maximumf %22, %23 : vector<128x378xf32>
    %25 = arith.addf %24, %0 : vector<128x378xf32>
    %cst_18 = arith.constant 0.000000e+00 : f32
    %26 = vector.broadcast %cst_18 : f32 to vector<128x378xf32>
    %27 = arith.maximumf %25, %26 : vector<128x378xf32>
    %c0_19 = arith.constant 0 : index
    %c0_20 = arith.constant 0 : index
    %28 = vector.load %arg8[%c0_19, %c0_20] : memref<128x378xf32, #tpu.memory_space<vmem>>, vector<128x378xf32>
    tpu.vector_store %arg8[%c0_19, %c0_20], %27 {strides = array<i32>} : memref<128x378xf32, #tpu.memory_space<vmem>>, vector<128x378xf32>,
    return
  }
  func.func @transform_0(%arg0: i32) -> (i32, i32) {
    %c0_i32 = arith.constant 0 : i32
    %c0_i32_0 = arith.constant 0 : i32
    return %arg0, %c0_i32 : i32, i32
  }
  func.func @transform_1(%arg0: i32) -> (i32, i32) {
    %c0_i32 = arith.constant 0 : i32
    %c0_i32_0 = arith.constant 0 : i32
    %c0_i32_1 = arith.constant 0 : i32
    return %c0_i32, %c0_i32_0 : i32, i32
  }
  func.func @transform_2(%arg0: i32) -> (i32, i32) {
    %c0_i32 = arith.constant 0 : i32
    %c0_i32_0 = arith.constant 0 : i32
    %c0_i32_1 = arith.constant 0 : i32
    return %c0_i32, %c0_i32_0 : i32, i32
  }
  func.func @transform_3(%arg0: i32) -> (i32, i32) {
    %c0_i32 = arith.constant 0 : i32
    %c0_i32_0 = arith.constant 0 : i32
    %c0_i32_1 = arith.constant 0 : i32
    return %c0_i32, %c0_i32_0 : i32, i32
  }
  func.func @transform_4(%arg0: i32) -> (i32, i32) {
    %c0_i32 = arith.constant 0 : i32
    %c0_i32_0 = arith.constant 0 : i32
    %c0_i32_1 = arith.constant 0 : i32
    return %c0_i32, %c0_i32_0 : i32, i32
  }
  func.func @transform_5(%arg0: i32) -> (i32, i32) {
    %c0_i32 = arith.constant 0 : i32
    %c0_i32_0 = arith.constant 0 : i32
    %c0_i32_1 = arith.constant 0 : i32
    return %c0_i32, %c0_i32_0 : i32, i32
  }
  func.func @transform_6(%arg0: i32) -> (i32, i32) {
    %c0_i32 = arith.constant 0 : i32
    %c0_i32_0 = arith.constant 0 : i32
    %c0_i32_1 = arith.constant 0 : i32
    return %c0_i32, %c0_i32_0 : i32, i32
  }
  func.func @transform_7(%arg0: i32) -> (i32, i32) {
    %c0_i32 = arith.constant 0 : i32
    %c0_i32_0 = arith.constant 0 : i32
    return %arg0, %c0_i32 : i32, i32
  }
}

</mosaic_0001>

<bundles_post_ra>
// kernel: residual_block.1
= control target key start
LH: loop header
LB: loop body
LE: loop exit
PB: predicated region body
PF: predicated region fallthrough
CT: control target
= control target key end

     0   :  { %12 = vsyncpa [#allocation3], 0  ;;  %s6451_s0 = inlined_call_operand.hbm [shape: f32[512,378], index: 0, kind: input, shape index: {}, may-alias: {0,7}]   ;;  %s6452_s1 = inlined_call_operand.vmem [shape: bf16[378,378], index: 1, kind: input, shape index: {}]   ;;  %s6453_s2 = inlined_call_operand.vmem [shape: f32[1,378], index: 2, kind: input, shape index: {}]   ;;  %s6454_s3 = inlined_call_operand.vmem [shape: bf16[378,378], index: 3, kind: input, shape index: {}]   ;;  %s6455_s4 = inlined_call_operand.vmem [shape: f32[1,378], index: 4, kind: input, shape index: {}]   ;;  %s6456_s5 = inlined_call_operand.vmem [shape: bf16[378,378], index: 5, kind: input, shape index: {}]   ;;  %s6457_s6 = inlined_call_operand.vmem [shape: f32[1,378], index: 6, kind: input, shape index: {}]   ;;  %s6458_s7 = inlined_call_operand.hbm [shape: f32[512,378], index: 7, kind: output, shape index: {}, may-alias: {0,7}]  }
   0x1   :  { %14 = vsyncpa [#allocation3 + $0x1], 0 }
   0x2   :  { %15 = vsyncpa [#allocation4], 0 }
   0x3   :  { %17 = vsyncpa [#allocation4 + $0x1], 0  ;;  %s4790_s24 = smov 0   ;;  %s4792_s25 = smov 0  }
   0x4   :  { %s4794_s26 = smov 0   ;;  %s4796_s27 = smov 0  }
   0x5 LB: > { %s4811_s28 = sadd.s32 4294967295, %s4741_s27   ;;  %s3640_s29 = sadd.s32 4294967294, %s4741_s27   ;;  %s4741_s27 = sphi %s4796_s27, %s6471_s27   ;;  %s4737_s26 = sphi %s4794_s26, %s6470_s26   ;;  %s4733_s25 = sphi %s4792_s25, %s6469_s25   ;;  %s4729_s24 = sphi %s4790_s24, %s6468_s24  }
   0x6   : > { %s4815_s30 = sadd.s32 1, %s4741_s27   ;;  %s30_s8 = sadd.s32 1, %s4737_s26 }
   0x7   : > { %s27_s9 = ssub.s32 %s4741_s27, %s4815_s30  ;;  %p37_p0 = scmp.ne.s32.totalorder %s4737_s26, %s4733_s25 }
   0x8   : > { %p28_p1 = scmp.eq.s32.totalorder %s27_s9, 0  ;;  %p38_p2 = scmp.eq.s32.totalorder %s4741_s27, 0 }
   0x9   : > { %p43_p3 = scmp.ne.s32.totalorder %s4733_s25, %s4729_s24  ;;  %p44_p4 = scmp.eq.s32.totalorder %s4811_s28, 0 }
   0xa   : > { %s4827_s10 = scalar_select %p28_p1, %s4737_s26, %s30_s8  }
   0xb   : > { %p39_p5 = por %p38_p2, %p37_p0  ;;  %p4829_p6 = por %p44_p4, %p43_p3 }
   0xc   : > { %p193_p7 = scmp.eq.s32.totalorder %s4811_s28, 3  ;;  %p199_p8 = scmp.eq.s32.totalorder %s3640_s29, 3 }
   0xd   : > { %s6461_s11 = scalar_select %p4829_p6, 1, 0 }
   0xe   : > { %p4274_p9 = scmp.lt.s32.totalorder %s4741_s27, 4  ;;  %p4835_p10 = por %p193_p7, %p37_p0 }
   0xf   : > { %p4839_p11 = por %p199_p8, %p43_p3  ;;  %s237_s14 = sand.u32 1, %s4737_s26  }
  0x10   : > { %s6462_s12 = scalar_select %p4835_p10, 1, 0 }
  0x11   : > { %s6463_s13 = scalar_select %p4839_p11, 1, 0 }
  0x12   : > { %s4259_s15 = smul.u32 6144, %s4741_s27  ;;  %p4850_p12 = pnand %p4274_p9, %p39_p5 }
  0x13   : > { %s4258_s16 = smul.u32 384, %s237_s14  ;;  %s4856_s23 = scalar_lea.sflag [#allocation3], %s237_s14 }
  0x14   : > { %s4848_s19 = scalar_lea.hbm %s6451_s0, %s4259_s15  ;;  %p4651_p0 = pneg %p4850_p12 }
  0x15   : > { %s241_s21 = scalar_lea.vmem [#allocation2], %s4258_s16  ;;  %s4649_s29 = scalar_lea.hbm %s4848_s19, 6144 }
  0x16   : > { %s249_s22 = sshll.u32 %s241_s21, 4  ;;  %p4650_p13 = scmp.ne.s32.totalorder %s4848_s19, %s4649_s29  ;;  %s4854_s22 = int_to_ptr.vmem [resolvable:$true] %s249_s22 }
  0x17   : > { %s4654_s15 = scalar_lea.hbm %s6451_s0, 24576  ;;  %p4655_p3 = scmp.lt.s32.totalorder %s4848_s19, %s6451_s0 }
  0x18   : > { %p4652_p1 = pnand %p4651_p0, %p4650_p13  ;;  %p4656_p4 = scmp.lt.s32.totalorder %s4654_s15, %s4649_s29 }
  0x1a   : > { %p4653_p2 = pneg %p4652_p1  ;;  %p4657_p5 = por %p4656_p4, %p4655_p3 }
  0x1c   : > { %p4658_p7 = pnand %p4657_p5, %p4653_p2 }
  0x1e   : > { %4661 = shalt.err (!%p4658_p7)
}
  0x1f   : > { %s4662_s14 = scalar_lea.vmem %s4854_s22, 6144  ;;  %s4743_s16 = smov [#allocation2]  }
  0x20   : > { %p4663_p8 = scmp.ne.s32.totalorder %s4854_s22, %s4662_s14  ;;  %s4667_s21 = sshll.u32 %s4743_s16, 4  ;;  %s4668_s21 = int_to_ptr.vmem [resolvable:$false] %s4667_s21 }
  0x21   : > { %s4669_s8 = scalar_lea.vmem %s4668_s21, 12288  ;;  %p4670_p1 = scmp.lt.s32.totalorder %s4854_s22, %s4668_s21 }
  0x22   : > { %p4665_p9 = pnand %p4663_p8, %p4651_p0  ;;  %p4671_p11 = scmp.lt.s32.totalorder %s4669_s8, %s4662_s14 }
  0x24   : > { %p4666_p13 = pneg %p4665_p9  ;;  %p4672_p10 = por %p4671_p11, %p4670_p1 }
  0x26   : > { %p4673_p6 = pnand %p4672_p10, %p4666_p13 }
  0x28   : > { %4676 = shalt.err (!%p4673_p6)
}
  0x29   : > { %s4744_s29 = smov 384   ;;  %s4745_s9 = smov 24  }
  0x2a   : > { %4269 = dma.hbm_to_vmem [thread:$0]  (!%p4850_p12), %s4848_s19, 6144, %s4854_s22, %s4856_s23, %s4744_s29, %s4744_s29, %s4745_s9  }
  0x2b   : > { %p3646_p0 = scmp.ge.s32.totalorder %s4741_s27, 1  ;;  %p257_p2 = scmp.lt.s32.totalorder %s4741_s27, 5 }
  0x2d   : > { %p258_p3 = pnand %p3646_p0, %p257_p2 }
  0x2e   : > { %s4880_s15 = sand.u32 (!%p258_p3), 1, %s4733_s25   ;;  %p6465_p6 = scmp.ne.s32.totalorder (!%p258_p3), %s6461_s11, 0 }
  0x2f   : > { %261 = sbr.rel (%p258_p3) target bundleno = 1005 (0x3ed), region = 48  ;;  %s264_s18 = scalar_lea.sflag (!%p258_p3), [#allocation3], %s4880_s15 }
  0x30   : > { %s4260_s17 = smul.u32 (!%p258_p3), 384, %s4880_s15 }
  0x32   : > { %s4886_s14 = scalar_lea.vmem (!%p258_p3), [#allocation2], %s4260_s17 }
  0x34   : > { %4720 = dma.done.wait (%p6465_p6), %s264_s18, 6144  }
  0x35   : > { %4722 = vsyncadd (%p6465_p6), %s264_s18, 4294961152  ;;  %v4746_v0 = vmov 0   ;;  %v4313_v1 = vld [vmem:[%s6452_s1 + $0xac] ss:$12 sps:$4 sm:$0xff]   ;;  %v4315_v2 = vld [vmem:[%s6452_s1 + $0xa8] ss:$12 sps:$4 sm:$0xff]  }
  0x36   : > { %1047 = vmatprep.mubr.bf16.mxu1 %v4746_v0  ;;  %902 = vmatprep.subr.bf16.mxu0 %v4313_v1  ;;  %v4316_v3 = vld [vmem:[%s6452_s1 + $0x94] ss:$12 sps:$4 sm:$0xff]   ;;  %v4318_v4 = vld [vmem:[%s6452_s1 + $0x90] ss:$12 sps:$4 sm:$0xff]   ;;  %vm892_vm0 = vcmask 1044480   ;;  %v306_v38 = vld [vmem:[%s4886_s14 + $0x28] sm:$0xff] }
  0x37   : > { %903 = vmatpush1.bf16.msra.mxu0 %v4315_v2  ;;  %v4319_v5 = vld [vmem:[%s6452_s1 + $0x7c] ss:$12 sps:$4 sm:$0xff]   ;;  %v4322_v6 = vld [vmem:[%s6452_s1 + $0x22c] ss:$12 sps:$4 sm:$0x1f]   ;;  %v303_v37 = vld [vmem:[%s4886_s14 + $0x10] sm:$0xff] }
  0x38   : > { %904 = vmatprep.subr.bf16.mxu0 %v4316_v3  ;;  %v4324_v7 = vld [vmem:[%s6452_s1 + $0x228] ss:$12 sps:$4 sm:$0x1f]   ;;  %v4321_v8 = vld [vmem:[%s6452_s1 + $0x78] ss:$12 sps:$4 sm:$0xff]   ;;  %3719 = vmatprep.subr.msk.bf16.mxu1 %vm892_vm0, %v4322_v6  ;;  %v5008_v41 = vpack.c.bf16 %v306_v38, %v303_v37  ;;  %vm867_vm1 = vcmask 998400  }
  0x39   : > { %v894_v9 = vsel %vm892_vm0, %v4324_v7, 0  ;;  %v4325_v10 = vld [vmem:[%s6452_s1 + $0x64] ss:$12 sps:$4 sm:$0xff]   ;;  %v4328_v11 = vld [vmem:[%s6452_s1 + $0x214] ss:$12 sps:$4 sm:$0xff]   ;;  %v302_v43 = vld [vmem:[%s4886_s14 + $0x8] sm:$0xff] }
  0x3a   : > { %1016 = vmatpush1.bf16.msra.mxu1 %v894_v9  ;;  %v4330_v12 = vld [vmem:[%s6452_s1 + $0x210] ss:$12 sps:$4 sm:$0xff]   ;;  %v4327_v14 = vld [vmem:[%s6452_s1 + $0x60] ss:$12 sps:$4 sm:$0xff]   ;;  %v4336_v16 = vld [vmem:[%s6452_s1 + $0x1f8] ss:$12 sps:$4 sm:$0xff]  }
  0x3b   : > { %905 = vmatpush1.bf16.msra.mxu0 %v4318_v4  ;;  %1017 = vmatprep.subr.bf16.mxu1 %v4328_v11  ;;  %v4334_v13 = vld [vmem:[%s6452_s1 + $0x1fc] ss:$12 sps:$4 sm:$0xff]   ;;  %v4331_v15 = vld [vmem:[%s6452_s1 + $0x4c] ss:$12 sps:$4 sm:$0xff]   ;;  %v4340_v17 = vld [vmem:[%s6452_s1 + $0x1e4] ss:$12 sps:$4 sm:$0xff]  }
  0x3c   : > { %906 = vmatprep.subr.bf16.mxu0 %v4319_v5  ;;  %v4333_v18 = vld [vmem:[%s6452_s1 + $0x48] ss:$12 sps:$4 sm:$0xff]   ;;  %v4342_v20 = vld [vmem:[%s6452_s1 + $0x1e0] ss:$12 sps:$4 sm:$0xff]   ;;  %v4339_v22 = vld [vmem:[%s6452_s1 + $0x30] ss:$12 sps:$4 sm:$0xff]  }
  0x3d   : > { %v4337_v19 = vld [vmem:[%s6452_s1 + $0x34] ss:$12 sps:$4 sm:$0xff]   ;;  %v4346_v21 = vld [vmem:[%s6452_s1 + $0x1cc] ss:$12 sps:$4 sm:$0xff]   ;;  %v4343_v23 = vld [vmem:[%s6452_s1 + $0x1c] ss:$12 sps:$4 sm:$0xff]  }
  0x3e   : > { %1018 = vmatpush1.bf16.msra.mxu1 %v4330_v12  ;;  %v4348_v24 = vld [vmem:[%s6452_s1 + $0x1c8] ss:$12 sps:$4 sm:$0xff]   ;;  %v4345_v26 = vld [vmem:[%s6452_s1 + $0x18] ss:$12 sps:$4 sm:$0xff]   ;;  %v4354_v28 = vld [vmem:[%s6452_s1 + $0x1b0] ss:$12 sps:$4 sm:$0xff]  }
  0x3f   : > { %907 = vmatpush1.bf16.msra.mxu0 %v4321_v8  ;;  %1019 = vmatprep.subr.bf16.mxu1 %v4334_v13  ;;  %v4352_v25 = vld [vmem:[%s6452_s1 + $0x1b4] ss:$12 sps:$4 sm:$0xff]   ;;  %v4349_v27 = vld [vmem:[%s6452_s1 + $0x4] ss:$12 sps:$4 sm:$0xff]   ;;  %v4358_v29 = vld [vmem:[%s6452_s1 + $0x19c] ss:$12 sps:$4 sm:$0xff]  }
  0x40   : > { %908 = vmatprep.subr.bf16.mxu0 %v4325_v10  ;;  %v4351_v30 = vld [vmem:[%s6452_s1] ss:$12 sps:$4 sm:$0xff]   ;;  %v4360_v32 = vld [vmem:[%s6452_s1 + $0x198] ss:$12 sps:$4 sm:$0xff]   ;;  %v4357_v34 = vld [vmem:[%s6452_s1 + $0x168] ss:$12 sps:$4 sm:$0xff]  }
  0x41   : > { %v4355_v31 = vld [vmem:[%s6452_s1 + $0x16c] ss:$12 sps:$4 sm:$0xff]   ;;  %v4364_v33 = vld [vmem:[%s6452_s1 + $0x184] ss:$12 sps:$4 sm:$0xff]   ;;  %v4361_v35 = vld [vmem:[%s6452_s1 + $0x154] ss:$12 sps:$4 sm:$0xff]  }
  0x42   : > { %1020 = vmatpush1.bf16.msra.mxu1 %v4336_v16  ;;  %v4366_v36 = vld [vmem:[%s6452_s1 + $0x180] ss:$12 sps:$4 sm:$0xff]   ;;  %v4384_v39 = vld [vmem:[%s6452_s1 + $0x170] ss:$12 sps:$4 sm:$0xff]   ;;  %v4369_v47 = vld [vmem:[%s6452_s1 + $0x138] ss:$12 sps:$4 sm:$0xff]  }
  0x43   : > { %909 = vmatpush1.bf16.msra.mxu0 %v4327_v14  ;;  %1021 = vmatprep.subr.bf16.mxu1 %v4340_v17  ;;  %v4363_v40 = vld [vmem:[%s6452_s1 + $0x150] ss:$12 sps:$4 sm:$0xff]   ;;  %v305_v44 = vld [vmem:[%s4886_s14 + $0x20] sm:$0xff]  ;;  %v4373_v54 = vld [vmem:[%s6452_s1 + $0x10c] ss:$12 sps:$4 sm:$0xff]   ;;  %s6215_s9 = scalar_lea.vmem [#allocation5], %s4260_s17 }
  0x44   : > { %910 = vmatprep.subr.bf16.mxu0 %v4331_v15  ;;  %v4367_v42 = vld [vmem:[%s6452_s1 + $0x13c] ss:$12 sps:$4 sm:$0xff]   ;;  %v5018_v46 = vpack.c.bf16 %v305_v44, %v302_v43  ;;  %v4370_v48 = vld [vmem:[%s6452_s1 + $0x124] ss:$12 sps:$4 sm:$0xff]   ;;  %v4372_v53 = vld [vmem:[%s6452_s1 + $0x120] ss:$12 sps:$4 sm:$0xff]  }
  0x45   : > { %v4386_v45 = vld [vmem:[%s6452_s1 + $0xb0] ss:$12 sps:$4 sm:$0xff]   ;;  %v309_v49 = vld [vmem:[%s4886_s14 + $0x40] sm:$0xff]  ;;  %v4375_v58 = vld [vmem:[%s6452_s1 + $0x108] ss:$12 sps:$4 sm:$0xff]   ;;  %s4261_s17 = smul.u32 6144, %s4811_s28 }
  0x46   : > { %1022 = vmatpush1.bf16.msra.mxu1 %v4342_v20  ;;  %v4388_v50 = vld [vmem:[%s6452_s1 + $0x158] ss:$12 sps:$4 sm:$0xff]   ;;  %934 = vmatprep.mubr.bf16.mxu0 %v5018_v46  ;;  %v4391_v56 = vld [vmem:[%s6452_s1 + $0x140] ss:$12 sps:$4 sm:$0xff]   ;;  %v315_v60 = vld [vmem:[%s4886_s14 + $0x70] sm:$0xff]  ;;  %s3567_s18 = sshll.u32 %s6215_s9, 4  ;;  %s6407_s18 = int_to_ptr.vmem [resolvable:$true] %s3567_s18 }
  0x47   : > { %911 = vmatpush1.bf16.msra.mxu0 %v4333_v18  ;;  %1023 = vmatprep.subr.bf16.mxu1 %v4346_v21  ;;  %v312_v51 = vld [vmem:[%s4886_s14 + $0x58] sm:$0xff]  ;;  %v4392_v57 = vld [vmem:[%s6452_s1 + $0x80] ss:$12 sps:$4 sm:$0xff]   ;;  %v4394_v62 = vld [vmem:[%s6452_s1 + $0x128] ss:$12 sps:$4 sm:$0xff]   ;;  %s6405_s22 = scalar_lea.hbm %s6458_s7, %s4261_s17  ;;  %s3553_s28 = scalar_lea.sflag [#allocation4], %s4880_s15 }
  0x48   : > { %912 = vmatprep.subr.bf16.mxu0 %v4337_v19  ;;  %v4389_v52 = vld [vmem:[%s6452_s1 + $0x98] ss:$12 sps:$4 sm:$0xff]   ;;  %v5044_v55 = vpack.c.bf16 %v312_v51, %v309_v49  ;;  %v4376_v59 = vld [vmem:[%s6452_s1 + $0xf4] ss:$12 sps:$4 sm:$0xff]   ;;  %v318_v61 = vld [vmem:[%s4886_s14 + $0x88] sm:$0xff]  ;;  %s4677_s23 = scalar_lea.vmem %s6407_s18, 6144 }
  0x49   : > { %v4395_v63 = vld [vmem:[%s6452_s1 + $0x68] ss:$12 sps:$4 sm:$0xff]   ;;  %v4378_v1 = vld [vmem:[%s6452_s1 + $0xf0] ss:$12 sps:$4 sm:$0xff]   ;;  %v5072_v2 = vpack.c.bf16 %v318_v61, %v315_v60  ;;  %v4381_v4 = vld [vmem:[%s6452_s1 + $0xd8] ss:$12 sps:$4 sm:$0xff]   ;;  %p4678_p10 = scmp.ne.s32.totalorder %s6407_s18, %s4677_s23 }
  0x4a   : > { %1024 = vmatpush1.bf16.msra.mxu1 %v4348_v24  ;;  %v4379_v3 = vld [vmem:[%s6452_s1 + $0xdc] ss:$12 sps:$4 sm:$0xff]   ;;  %v4382_v5 = vld [vmem:[%s6452_s1 + $0xc4] ss:$12 sps:$4 sm:$0xff]   ;;  %v4385_v11 = vld [vmem:[%s6452_s1 + $0xc0] ss:$12 sps:$4 sm:$0xff]  }
  0x4b   : > { %913 = vmatpush1.bf16.msra.mxu0 %v4339_v22  ;;  %1025 = vmatprep.subr.bf16.mxu1 %v4352_v25  ;;  %v321_v6 = vld [vmem:[%s4886_s14 + $0xa0] sm:$0xff]  ;;  %v324_v7 = vld [vmem:[%s4886_s14 + $0xb8] sm:$0xff]  ;;  %v311_v18 = vld [vmem:[%s4886_s14 + $0x50] sm:$0xff]  ;;  %p6466_p11 = scmp.ne.s32.totalorder %s6462_s12, 0 }
  0x4c   : > { %914 = vmatprep.subr.bf16.mxu0 %v4343_v23  ;;  %v4397_v8 = vld [vmem:[%s6452_s1 + $0x110] ss:$12 sps:$4 sm:$0xff]   ;;  %v4399_v10 = vld [vmem:[%s6452_s1 + $0xf8] ss:$12 sps:$4 sm:$0xff]   ;;  %v5108_v16 = vpack.c.bf16 %v324_v7, %v321_v6  ;;  %v4402_v19 = vld [vmem:[%s6452_s1 + $0xe0] ss:$12 sps:$4 sm:$0xff]  }
  0x4d   : > { %v4398_v9 = vld [vmem:[%s6452_s1 + $0x50] ss:$12 sps:$4 sm:$0xff]   ;;  %v301_v12 = vld [vmem:[%s4886_s14] sm:$0xff]  ;;  %p4679_p12 = pnand %p4678_p10, %p6466_p11 }
  0x4e   : > { %1026 = vmatpush1.bf16.msra.mxu1 %v4354_v28  ;;  %v4387_v13 = vld [vmem:[%s6452_s1 + $0x230] ss:$12 sps:$4 sm:$0x1f]   ;;  %v4400_v14 = vld [vmem:[%s6452_s1 + $0x38] ss:$12 sps:$4 sm:$0xff]  }
  0x4f   : > { %915 = vmatpush1.bf16.msra.mxu0 %v4345_v26  ;;  %1027 = vmatprep.subr.bf16.mxu1 %v4358_v29  ;;  %v304_v15 = vld [vmem:[%s4886_s14 + $0x18] sm:$0xff]  ;;  %v327_v22 = vld [vmem:[%s4886_s14 + $0xd0] sm:$0xff]  ;;  %v4403_v23 = vld [vmem:[%s6452_s1 + $0x20] ss:$12 sps:$4 sm:$0xff]   ;;  %v900_v24 = vsel %vm892_vm0, %v4387_v13, 0  ;;  %p4680_p4 = pneg %p4679_p12 }
  0x50   : > { %916 = vmatprep.subr.bf16.mxu0 %v4349_v27  ;;  %v308_v17 = vld [vmem:[%s4886_s14 + $0x38] sm:$0xff]  ;;  %v5115_v20 = vpack.c.bf16 %v304_v15, %v301_v12  ;;  %v330_v26 = vld [vmem:[%s4886_s14 + $0xe8] sm:$0xff]  ;;  %v307_v29 = vld [vmem:[%s4886_s14 + $0x30] sm:$0xff] }
  0x51   : > { %v4390_v21 = vld [vmem:[%s6452_s1 + $0x218] ss:$12 sps:$4 sm:$0xff]   ;;  %v5127_v25 = vpack.c.bf16 %v311_v18, %v308_v17  ;;  %v4404_v27 = vld [vmem:[%s6452_s1 + $0xc8] ss:$12 sps:$4 sm:$0xff]   ;;  %v4412_v18 = vld [vmem:[%s6454_s3 + $0x90] ss:$12 sps:$4 sm:$0xff]  }
  0x52   : > { %1028 = vmatpush1.bf16.msra.mxu1 %v4360_v32  ;;  %v4405_v28 = vld [vmem:[%s6452_s1 + $0x8] ss:$12 sps:$4 sm:$0xff]   ;;  %v336_v38 = vld [vmem:[%s4886_s14 + $0x118] sm:$0xff] }
  0x53   : > { %917 = vmatpush1.bf16.msra.mxu0 %v4351_v30  ;;  %1029 = vmatprep.subr.bf16.mxu1 %v4364_v33  ;;  %v310_v30 = vld [vmem:[%s4886_s14 + $0x48] sm:$0xff]  ;;  %v317_v33 = vld [vmem:[%s4886_s14 + $0x80] sm:$0xff]  ;;  %v316_v43 = vld [vmem:[%s4886_s14 + $0x78] sm:$0xff] }
  0x54   : > { %918 = vmatprep.subr.bf16.mxu0 %v4355_v31  ;;  %v5142_v31 = vpack.c.bf16 %v330_v26, %v327_v22  ;;  %v314_v32 = vld [vmem:[%s4886_s14 + $0x68] sm:$0xff]  ;;  %v339_v51 = vld [vmem:[%s4886_s14 + $0x130] sm:$0xff]  ;;  %v332_v6 = vld [vmem:[%s4886_s14 + $0xf8] sm:$0xff] }
  0x55   : > { %v5154_v37 = vpack.c.bf16 %v317_v33, %v314_v32  ;;  %v335_v7 = vld [vmem:[%s4886_s14 + $0x110] sm:$0xff]  ;;  %v334_v12 = vld [vmem:[%s4886_s14 + $0x108] sm:$0xff]  ;;  %v340_v22 = vld [vmem:[%s4886_s14 + $0x138] sm:$0xff] }
  0x56   : > { %1030 = vmatpush1.bf16.msra.mxu1 %v4366_v36  ;;  %v333_v36 = vld [vmem:[%s4886_s14 + $0x100] sm:$0xff]  ;;  %v4409_v15 = vld [vmem:[%s6454_s3 + $0xa8] ss:$12 sps:$4 sm:$0xff]   ;;  %v4423_v33 = vld [vmem:[%s6454_s3 + $0x4c] ss:$12 sps:$4 sm:$0xff]  }
  0x57   : > { %919 = vmatpush2.bf16.msra.mxu0 %v4357_v34  ;;  %3919 = vmatprep.subr.bf16.mxu1 %v4384_v39  ;;  %v4393_v34 = vld [vmem:[%s6452_s1 + $0x200] ss:$12 sps:$4 sm:$0xff]   ;;  %v4396_v39 = vld [vmem:[%s6452_s1 + $0x1e8] ss:$12 sps:$4 sm:$0xff]   ;;  %v5168_v44 = vpack.c.bf16 %v336_v38, %v333_v36 }
  0x58   : > { %920 = vmatprep.subr.bf16.mxu0 %v4361_v35  ;;  %v5149_v35 = vpack.c.bf16 %v310_v30, %v307_v29  ;;  %v4414_v17 = vld [vmem:[%s6454_s3 + $0x94] ss:$12 sps:$4 sm:$0xff]   ;;  %v346_v32 = vld [vmem:[%s4886_s14 + $0x168] sm:$0xff] }
  0x59   : > { %3720 = vmatmul.mubr.msk.bf16.vlgmr.msra.gmra.mxu1 %vm867_vm1, %v5008_v41  ;;  %v347_v26 = vld [vmem:[%s4886_s14 + $0x170] sm:$0xff]  ;;  %v4429_v38 = vld [vmem:[%s6454_s3 + $0x1c] ss:$12 sps:$4 sm:$0xff]  }
  0x5a   : > { %1057 = vmatprep.mubr.bf16.mxu1 %v4746_v0  ;;  %3920 = vmatpush3.bf16.msra.mxu1 %v4386_v45  ;;  %v320_v45 = vld [vmem:[%s4886_s14 + $0x98] sm:$0xff]  ;;  %v343_v30 = vld [vmem:[%s4886_s14 + $0x150] sm:$0xff] }
  0x5b   : > { %921 = vmatpush2.bf16.msra.mxu0 %v4363_v40  ;;  %3921 = vmatprep.subr.bf16.mxu1 %v4388_v50  ;;  %v4411_v40 = vld [vmem:[%s6454_s3 + $0xac] ss:$12 sps:$4 sm:$0xff]   ;;  %v370_v36 = vpack.c.bf16 %v346_v32, %v343_v30 }
  0x5c   : > { %922 = vmatprep.subr.bf16.mxu0 %v4367_v42  ;;  %v313_v42 = vld [vmem:[%s4886_s14 + $0x60] sm:$0xff] }
  0x5d   : > { %v5175_v49 = vpack.c.bf16 %v316_v43, %v313_v42  ;;  %v4430_v42 = vld [vmem:[%s6454_s3] ss:$12 sps:$4 sm:$0xff]   ;;  %v4433_v43 = vld [vmem:[%s6454_s3 + $0x168] ss:$12 sps:$4 sm:$0xff]  }
  0x5e   : > { %3922 = vmatpush3.bf16.msra.mxu1 %v4389_v52  ;;  %v342_v52 = vld [vmem:[%s4886_s14 + $0x148] sm:$0xff] }
  0x5f   : > { %923 = vmatpush2.bf16.msra.mxu0 %v4369_v47  ;;  %3923 = vmatprep.subr.bf16.mxu1 %v4391_v56  ;;  %v323_v47 = vld [vmem:[%s4886_s14 + $0xb0] sm:$0xff]  ;;  %v322_v56 = vld [vmem:[%s4886_s14 + $0xa8] sm:$0xff]  ;;  %v5196_v60 = vpack.c.bf16 %v342_v52, %v339_v51  ;;  %v4451_v52 = vld [vmem:[%s6454_s3 + $0xd8] ss:$12 sps:$4 sm:$0xff]  }
  0x60   : > { %924 = vmatprep.subr.bf16.mxu0 %v4370_v48  ;;  %v4401_v48 = vld [vmem:[%s6452_s1 + $0x1d0] ss:$12 sps:$4 sm:$0xff]   ;;  %v5179_v50 = vpack.c.bf16 %v323_v47, %v320_v45  ;;  %v4438_v45 = vld [vmem:[%s6454_s3 + $0x154] ss:$12 sps:$4 sm:$0xff]   ;;  %v4439_v47 = vld [vmem:[%s6454_s3 + $0x138] ss:$12 sps:$4 sm:$0xff]  }
  0x61   : > { %3721 = vmatmul.mubr.msk.bf16.gmra.mxu1 %vm867_vm1, %v5044_v55  ;;  %v4453_v51 = vld [vmem:[%s6454_s3 + $0xdc] ss:$12 sps:$4 sm:$0xff]  }
  0x62   : > { %1067 = vmatprep.mubr.bf16.mxu1 %v4746_v0  ;;  %3924 = vmatpush3.bf16.msra.mxu1 %v4392_v57  ;;  %v326_v57 = vld [vmem:[%s4886_s14 + $0xc8] sm:$0xff] }
  0x63   : > { %925 = vmatpush2.bf16.msra.mxu0 %v4372_v53  ;;  %3925 = vmatprep.subr.bf16.mxu1 %v4394_v62  ;;  %v4406_v53 = vld [vmem:[%s6452_s1 + $0x1b8] ss:$12 sps:$4 sm:$0xff]  }
  0x64   : > { %926 = vmatprep.subr.bf16.mxu0 %v4373_v54  ;;  %v319_v54 = vld [vmem:[%s4886_s14 + $0x90] sm:$0xff]  ;;  %v345_v62 = vld [vmem:[%s4886_s14 + $0x160] sm:$0xff] }
  0x65   : > { %v5198_v61 = vpack.c.bf16 %v322_v56, %v319_v54  ;;  %v4454_v54 = vld [vmem:[%s6454_s3 + $0xc0] ss:$12 sps:$4 sm:$0xff]  }
  0x66   : > { %3926 = vmatpush3.bf16.msra.mxu1 %v4395_v63  ;;  %v348_v63 = vld [vmem:[%s4886_s14 + $0x178] sm:$0xff] }
  0x67   : > { %927 = vmatpush2.bf16.msra.mxu0 %v4375_v58  ;;  %3927 = vmatprep.subr.bf16.mxu1 %v4397_v8  ;;  %v329_v58 = vld [vmem:[%s4886_s14 + $0xe0] sm:$0xff]  ;;  %v5216_v8 = vpack.c.bf16 %v348_v63, %v345_v62  ;;  %v4457_v56 = vld [vmem:[%s6454_s3 + $0x22c] ss:$12 sps:$4 sm:$0x1f]   ;;  %v4467_v62 = vld [vmem:[%s6454_s3 + $0x1fc] ss:$12 sps:$4 sm:$0xff]  }
  0x68   : > { %928 = vmatprep.subr.bf16.mxu0 %v4376_v59  ;;  %v4407_v59 = vld [vmem:[%s6452_s1 + $0x1a0] ss:$12 sps:$4 sm:$0xff]   ;;  %v4465_v63 = vld [vmem:[%s6454_s3 + $0x1f8] ss:$12 sps:$4 sm:$0xff]  }
  0x69   : > { %3722 = vmatmul.mubr.msk.bf16.gmra.mxu1 %vm867_vm1, %v5072_v2 }
  0x6a   : > { %1077 = vmatprep.mubr.bf16.mxu1 %v4746_v0  ;;  %3928 = vmatpush3.bf16.msra.mxu1 %v4398_v9 }
  0x6b   : > { %929 = vmatpush2.bf16.msra.mxu0 %v4378_v1  ;;  %3929 = vmatprep.subr.bf16.mxu1 %v4399_v10  ;;  %v4408_v1 = vld [vmem:[%s6452_s1 + $0x188] ss:$12 sps:$4 sm:$0xff]   ;;  %v5222_v10 = vpack.c.bf16 %v335_v7, %v332_v6  ;;  %v4477_v7 = vld [vmem:[%s6454_s3 + $0x1b0] ss:$12 sps:$4 sm:$0xff]  }
  0x6c   : > { %930 = vmatprep.subr.bf16.mxu0 %v4379_v3  ;;  %v5207_v3 = vpack.c.bf16 %v329_v58, %v326_v57  ;;  %v4459_v57 = vld [vmem:[%s6454_s3 + $0x228] ss:$12 sps:$4 sm:$0x1f]  }
  0x6d   : > { %v1913_v58 = vsel %vm892_vm0, %v4459_v57, 0  ;;  %v4479_v6 = vld [vmem:[%s6454_s3 + $0x1b4] ss:$12 sps:$4 sm:$0xff]  }
  0x6e   : > { %3930 = vmatpush3.bf16.msra.mxu1 %v4400_v14  ;;  %v341_v14 = vld [vmem:[%s4886_s14 + $0x140] sm:$0xff] }
  0x6f   : > { %931 = vmatpush2.bf16.msra.mxu0 %v4381_v4  ;;  %3931 = vmatprep.subr.bf16.mxu1 %v4402_v19  ;;  %v325_v4 = vld [vmem:[%s4886_s14 + $0xc0] sm:$0xff] }
  0x70   : > { %932 = vmatprep.subr.bf16.mxu0 %v4382_v5  ;;  %v328_v5 = vld [vmem:[%s4886_s14 + $0xd8] sm:$0xff] }
  0x71   : > { %3723 = vmatmul.mubr.msk.bf16.gmra.mxu1 %vm867_vm1, %v5108_v16  ;;  %v5218_v9 = vpack.c.bf16 %v328_v5, %v325_v4  ;;  %v4475_v4 = vld [vmem:[%s6454_s3 + $0x1cc] ss:$12 sps:$4 sm:$0xff]   ;;  %v4473_v5 = vld [vmem:[%s6454_s3 + $0x1c8] ss:$12 sps:$4 sm:$0xff]  }
  0x72   : > { %1087 = vmatprep.mubr.bf16.mxu1 %v4746_v0  ;;  %3932 = vmatpush3.bf16.msra.mxu1 %v4403_v23  ;;  %v4417_v23 = vld [vmem:[%s6454_s3 + $0x7c] ss:$12 sps:$4 sm:$0xff]  }
  0x73   : > { %933 = vmatpush2.bf16.msra.mxu0 %v4385_v11  ;;  %3933 = vmatprep.subr.bf16.mxu1 %v4404_v27  ;;  %v331_v11 = vld [vmem:[%s4886_s14 + $0xf0] sm:$0xff] }
  0x74   : > { %4255 = vmatprep.subr.msk.bf16.mxu0 %vm892_vm0, %v4387_v13  ;;  %v338_v13 = vld [vmem:[%s4886_s14 + $0x128] sm:$0xff] }
  0x75   : > { %v5243_v19 = vpack.c.bf16 %v341_v14, %v338_v13 }
  0x76   : > { %935 = vmatmul.mubr.bf16.vlgmr.msra.gmra.mxu0 %v5115_v20  ;;  %3934 = vmatpush3.bf16.msra.mxu1 %v4405_v28  ;;  %v4418_v28 = vld [vmem:[%s6454_s3 + $0x60] ss:$12 sps:$4 sm:$0xff]  }
  0x77   : > { %4160 = vmatpush3.bf16.msra.mxu0 %v900_v24  ;;  %944 = vmatprep.mubr.bf16.mxu0 %v5127_v25  ;;  %v344_v24 = vld [vmem:[%s4886_s14 + $0x158] sm:$0xff] }
  0x78   : > { %4161 = vmatprep.subr.bf16.mxu0 %v4390_v21  ;;  %1921 = vmatprep.subr.bf16.mxu1 %v4411_v40  ;;  %v371_v29 = vpack.c.bf16 %v347_v26, %v344_v24  ;;  %v4432_v40 = vld [vmem:[%s6454_s3 + $0x4] ss:$12 sps:$4 sm:$0xff]  }
  0x79   : > { %3724 = vmatmul.mubr.msk.bf16.gmra.mxu1 %vm867_vm1, %v5142_v31 }
  0x7a   : > { %1097 = vmatprep.mubr.bf16.mxu1 %v4746_v0 }
  0x7b   : > { %4162 = vmatpush3.bf16.msra.mxu0 %v4390_v21  ;;  %v337_v21 = vld [vmem:[%s4886_s14 + $0x120] sm:$0xff] }
  0x7c   : > { %4163 = vmatprep.subr.bf16.mxu0 %v4393_v34  ;;  %v5261_v27 = vpack.c.bf16 %v340_v22, %v337_v21  ;;  %v471_v22 = vlaneseq }
  0x7e   : > { %945 = vmatmul.mubr.bf16.gmra.mxu0 %v5149_v35  ;;  %v5433_v26 = vshrl.u32 %v471_v22, 7 }
  0x7f   : > { %954 = vmatprep.mubr.bf16.mxu0 %v5154_v37  ;;  %4164 = vmatpush3.bf16.msra.mxu0 %v4393_v34  ;;  %v4421_v34 = vld [vmem:[%s6454_s3 + $0x48] ss:$12 sps:$4 sm:$0xff]  }
  0x80   : > { %4165 = vmatprep.subr.bf16.mxu0 %v4396_v39 }
  0x81   : > { %3725 = vmatmul.mubr.msk.bf16.gmra.mxu1 %vm867_vm1, %v5168_v44 }
  0x82   : > { %1107 = vmatprep.mubr.bf16.mxu1 %v4746_v0 }
  0x83   : > { %4166 = vmatpush3.bf16.msra.mxu0 %v4396_v39  ;;  %v4427_v39 = vld [vmem:[%s6454_s3 + $0x18] ss:$12 sps:$4 sm:$0xff]  }
  0x84   : > { %4167 = vmatprep.subr.bf16.mxu0 %v4401_v48 }
  0x86   : > { %955 = vmatmul.mubr.bf16.gmra.mxu0 %v5175_v49 }
  0x87   : > { %964 = vmatprep.mubr.bf16.mxu0 %v5179_v50  ;;  %4168 = vmatpush3.bf16.msra.mxu0 %v4401_v48  ;;  %v4444_v48 = vld [vmem:[%s6454_s3 + $0x124] ss:$12 sps:$4 sm:$0xff]  }
  0x88   : > { %4169 = vmatprep.subr.bf16.mxu0 %v4406_v53 }
  0x89   : > { %3726 = vmatmul.mubr.msk.bf16.gmra.mxu1 %vm867_vm1, %v5196_v60 }
  0x8a   : > { %1117 = vmatprep.mubr.bf16.mxu1 %v4746_v0 }
  0x8b   : > { %4170 = vmatpush3.bf16.msra.mxu0 %v4406_v53  ;;  %v4456_v53 = vld [vmem:[%s6454_s3 + $0xc4] ss:$12 sps:$4 sm:$0xff]  }
  0x8c   : > { %4171 = vmatprep.subr.bf16.mxu0 %v4407_v59 }
  0x8e   : > { %965 = vmatmul.mubr.bf16.gmra.mxu0 %v5198_v61 }
  0x8f   : > { %974 = vmatprep.mubr.bf16.mxu0 %v5207_v3  ;;  %4172 = vmatpush3.bf16.msra.mxu0 %v4407_v59  ;;  %v5380_v59 = vld [vmem:[%s6454_s3 + $0x230] ss:$12 sps:$4 sm:$0x1f]  }
  0x90   : > { %4173 = vmatprep.subr.bf16.mxu0 %v4408_v1 }
  0x91   : > { %3727 = vmatmul.mubr.msk.bf16.gmra.mxu1 %vm867_vm1, %v5216_v8 }
  0x92   : > { %1160 = vmatprep.mubr.bf16.mxu1 %v5018_v46  ;;  %v5237_v46 = vpack.c.bf16 %v334_v12, %v331_v11  ;;  %v4485_v11 = vld [vmem:[%s6454_s3 + $0x180] ss:$12 sps:$4 sm:$0xff]   ;;  %v4489_v12 = vld [vmem:[%s6454_s3 + $0x170] ss:$12 sps:$4 sm:$0xff]  }
  0x93   : > { %4174 = vmatpush3.bf16.msra.mxu0 %v4408_v1  ;;  %v4471_v1 = vld [vmem:[%s6454_s3 + $0x1e4] ss:$12 sps:$4 sm:$0xff]  }
  0x94   : > { %3808 = vmatprep.subr.msk.bf16.mxu0 %vm892_vm0, %v4457_v56 }
  0x96   : > { %975 = vmatmul.mubr.bf16.gmra.mxu0 %v5218_v9 }
  0x97   : > { %984 = vmatprep.mubr.bf16.mxu0 %v5222_v10 }
  0x99   : > { %1161 = vmatmul.mubr.bf16.vlgmr.msra.gmra.mxu1 %v5115_v20  ;;  %v4415_v20 = vld [vmem:[%s6454_s3 + $0x78] ss:$12 sps:$4 sm:$0xff]  }
  0x9a   : > { %1168 = vmatprep.mubr.bf16.mxu1 %v5127_v25  ;;  %1922 = vmatpush1.bf16.msra.mxu1 %v4409_v15  ;;  %v4420_v25 = vld [vmem:[%s6454_s3 + $0x64] ss:$12 sps:$4 sm:$0xff]  }
  0x9b   : > { %1923 = vmatprep.subr.bf16.mxu1 %v4414_v17 }
  0x9e   : > { %985 = vmatmul.mubr.bf16.gmra.mxu0 %v5237_v46  ;;  %1924 = vmatpush1.bf16.msra.mxu1 %v4412_v18 }
  0x9f   : > { %994 = vmatprep.mubr.bf16.mxu0 %v5243_v19  ;;  %1925 = vmatprep.subr.bf16.mxu1 %v4417_v23 }
  0xa1   : > { %1169 = vmatmul.mubr.bf16.gmra.mxu1 %v5149_v35  ;;  %v4426_v35 = vld [vmem:[%s6454_s3 + $0x34] ss:$12 sps:$4 sm:$0xff]  }
  0xa2   : > { %1176 = vmatprep.mubr.bf16.mxu1 %v5154_v37  ;;  %1926 = vmatpush1.bf16.msra.mxu1 %v4415_v20  ;;  %v4424_v37 = vld [vmem:[%s6454_s3 + $0x30] ss:$12 sps:$4 sm:$0xff]  }
  0xa3   : > { %1927 = vmatprep.subr.bf16.mxu1 %v4420_v25 }
  0xa6   : > { %995 = vmatmul.mubr.bf16.gmra.mxu0 %v5261_v27  ;;  %1928 = vmatpush1.bf16.msra.mxu1 %v4418_v28  ;;  %v5443_v28 = vsub.s32 0, %v5433_v26 }
  0xa7   : > { %1004 = vmatprep.mubr.bf16.mxu0 %v371_v29  ;;  %1929 = vmatprep.subr.bf16.mxu1 %v4423_v33 }
  0xa9   : > { %1177 = vmatmul.mubr.bf16.gmra.mxu1 %v5175_v49  ;;  %v4442_v49 = vld [vmem:[%s6454_s3 + $0x120] ss:$12 sps:$4 sm:$0xff]  }
  0xaa   : > { %1184 = vmatprep.mubr.bf16.mxu1 %v5179_v50  ;;  %1930 = vmatpush1.bf16.msra.mxu1 %v4421_v34  ;;  %v4450_v50 = vld [vmem:[%s6454_s3 + $0xf4] ss:$12 sps:$4 sm:$0xff]  }
  0xab   : > { %1931 = vmatprep.subr.bf16.mxu1 %v4426_v35 }
  0xae   : > { %1005 = vmatmul.mubr.bf16.gmra.mxu0 %v370_v36  ;;  %1932 = vmatpush1.bf16.msra.mxu1 %v4424_v37 }
  0xaf   : > { %4175 = vmatprep.mubr.msk.bf16.mxu0 %vm867_vm1, %v5008_v41  ;;  %1933 = vmatprep.subr.bf16.mxu1 %v4429_v38  ;;  %v4435_v41 = vld [vmem:[%s6454_s3 + $0x16c] ss:$12 sps:$4 sm:$0xff]  }
  0xb1   : > { %1185 = vmatmul.mubr.bf16.gmra.mxu1 %v5198_v61  ;;  %v4461_v61 = vld [vmem:[%s6454_s3 + $0x210] ss:$12 sps:$4 sm:$0xff]  }
  0xb2   : > { %1192 = vmatprep.mubr.bf16.mxu1 %v5207_v3  ;;  %1934 = vmatpush1.bf16.msra.mxu1 %v4427_v39  ;;  %v4469_v3 = vld [vmem:[%s6454_s3 + $0x1e0] ss:$12 sps:$4 sm:$0xff]  }
  0xb3   : > { %1935 = vmatprep.subr.bf16.mxu1 %v4432_v40 }
  0xb6   : > { %4176 = vmatmul.mubr.msk.bf16.vlgmr.msra.gmra.mxu0 %vm867_vm1, %v5044_v55  ;;  %1936 = vmatpush1.bf16.msra.mxu1 %v4430_v42  ;;  %v4436_v55 = vld [vmem:[%s6454_s3 + $0x150] ss:$12 sps:$4 sm:$0xff]  }
  0xb7   : > { %4179 = vmatprep.mubr.msk.bf16.mxu0 %vm867_vm1, %v5072_v2  ;;  %1937 = vmatprep.subr.bf16.mxu1 %v4435_v41  ;;  %v4441_v2 = vld [vmem:[%s6454_s3 + $0x13c] ss:$12 sps:$4 sm:$0xff]  }
  0xb8   : > { %2035 = vmatpush1.bf16.msra.mxu0 %v1913_v58 }
  0xb9   : > { %1193 = vmatmul.mubr.bf16.gmra.mxu1 %v5218_v9  ;;  %v4481_v9 = vld [vmem:[%s6454_s3 + $0x198] ss:$12 sps:$4 sm:$0xff]  }
  0xba   : > { %1200 = vmatprep.mubr.bf16.mxu1 %v5222_v10  ;;  %1938 = vmatpush2.bf16.msra.mxu1 %v4433_v43  ;;  %v4487_v10 = vld [vmem:[%s6454_s3 + $0x184] ss:$12 sps:$4 sm:$0xff]  }
  0xbb   : > { %1939 = vmatprep.subr.bf16.mxu1 %v4438_v45 }
  0xbe   : > { %4180 = vmatmul.mubr.msk.bf16.gmra.mxu0 %vm867_vm1, %v5108_v16  ;;  %1940 = vmatpush2.bf16.msra.mxu1 %v4436_v55  ;;  %v4447_v16 = vld [vmem:[%s6454_s3 + $0x10c] ss:$12 sps:$4 sm:$0xff]  }
  0xbf   : > { %4183 = vmatprep.mubr.msk.bf16.mxu0 %vm867_vm1, %v5142_v31  ;;  %1941 = vmatprep.subr.bf16.mxu1 %v4441_v2  ;;  %v4445_v31 = vld [vmem:[%s6454_s3 + $0x108] ss:$12 sps:$4 sm:$0xff]  }
  0xc1   : > { %1201 = vmatmul.mubr.bf16.gmra.mxu1 %v5237_v46 }
  0xc2   : > { %1208 = vmatprep.mubr.bf16.mxu1 %v5243_v19  ;;  %1942 = vmatpush2.bf16.msra.mxu1 %v4439_v47 }
  0xc3   : > { %1943 = vmatprep.subr.bf16.mxu1 %v4444_v48 }
  0xc6   : > { %4184 = vmatmul.mubr.msk.bf16.gmra.mxu0 %vm867_vm1, %v5168_v44  ;;  %1944 = vmatpush2.bf16.msra.mxu1 %v4442_v49  ;;  %v4448_v44 = vld [vmem:[%s6454_s3 + $0xf0] ss:$12 sps:$4 sm:$0xff]  }
  0xc7   : > { %4187 = vmatprep.mubr.msk.bf16.mxu0 %vm867_vm1, %v5196_v60  ;;  %1945 = vmatprep.subr.bf16.mxu1 %v4447_v16  ;;  %v4463_v60 = vld [vmem:[%s6454_s3 + $0x214] ss:$12 sps:$4 sm:$0xff]  }
  0xc8   : > { %2036 = vmatprep.subr.bf16.mxu0 %v4463_v60 }
  0xc9   : > { %1209 = vmatmul.mubr.bf16.gmra.mxu1 %v5261_v27  ;;  %2037 = vmatpush1.bf16.msra.mxu0 %v4461_v61  ;;  %v5440_v27 = vsub.s32 1, %v5433_v26 }
  0xca   : > { %1216 = vmatprep.mubr.bf16.mxu1 %v371_v29  ;;  %1946 = vmatpush2.bf16.msra.mxu1 %v4445_v31  ;;  %v5448_v29 = vld [vmem:[%s6453_s2] sm:$0x7] }
  0xcb   : > { %1947 = vmatprep.subr.bf16.mxu1 %v4450_v50  ;;  %2038 = vmatprep.subr.bf16.mxu0 %v4467_v62  ;;  %v5454_v32 = vrot.slane %v5448_v29, %v5440_v27  ;;  %v5460_v34 = vrot.slane %v5448_v29, %v5443_v28 }
  0xcd   : > { %2039 = vmatpush1.bf16.msra.mxu0 %v4465_v63 }
  0xce   : > { %4188 = vmatmul.mubr.msk.bf16.gmra.mxu0 %vm867_vm1, %v5216_v8  ;;  %1948 = vmatpush2.bf16.msra.mxu1 %v4448_v44  ;;  %v4483_v8 = vld [vmem:[%s6454_s3 + $0x19c] ss:$12 sps:$4 sm:$0xff]  }
  0xcf   : > { %2066 = vmatprep.mubr.bf16.mxu0 %v4746_v0  ;;  %1949 = vmatprep.subr.bf16.mxu1 %v4453_v51 }
  0xd0   : > { %2040 = vmatprep.subr.bf16.mxu0 %v4471_v1 }
  0xd1   : > { %1217 = vmatmul.mubr.bf16.gmra.mxu1 %v370_v36  ;;  %2041 = vmatpush1.bf16.msra.mxu0 %v4469_v3 }
  0xd2   : > { %1950 = vmatpush2.bf16.msra.mxu1 %v4451_v52  ;;  %2042 = vmatprep.subr.bf16.mxu0 %v4475_v4  ;;  %v1919_v4 = vsel %vm892_vm0, %v5380_v59, 0 }
  0xd3   : > { %1951 = vmatprep.subr.bf16.mxu1 %v4456_v53 }
  0xd5   : > { %2043 = vmatpush1.bf16.msra.mxu0 %v4473_v5  ;;  %v4464_v5 = vld [vmem:[%s6454_s3 + $0x218] ss:$12 sps:$4 sm:$0xff]  }
  0xd6   : > { %1952 = vmatpush2.bf16.msra.mxu1 %v4454_v54  ;;  %2044 = vmatprep.subr.bf16.mxu0 %v4479_v6 }
  0xd7   : > { %4256 = vmatprep.subr.msk.bf16.mxu1 %vm892_vm0, %v5380_v59 }
  0xd9   : > { %2045 = vmatpush1.bf16.msra.mxu0 %v4477_v7 }
  0xda   : > { %2046 = vmatprep.subr.bf16.mxu0 %v4483_v8 }
  0xdd   : > { %2047 = vmatpush1.bf16.msra.mxu0 %v4481_v9 }
  0xde   : > { %2048 = vmatprep.subr.bf16.mxu0 %v4487_v10 }
  0xe1   : > { %2049 = vmatpush1.bf16.msra.mxu0 %v4485_v11 }
  0xe2   : > { %3999 = vmatprep.subr.bf16.mxu0 %v4489_v12 }
 0x119   : > { %v1049_v13 = vpop.f32.mrf.mxu1 }
 0x11b   : > { %v1051_v14 = vpop.f32.mrf.mxu1 }
 0x11d   : > { %v1053_v15 = vpop.f32.mrf.mxu1 }
 0x11f   : > { %v1055_v17 = vpop.f32.mrf.mxu1 }
 0x121   : > { %v1059_v46 = vpop.f32.mrf.mxu1 }
 0x123   : > { %v1061_v18 = vpop.f32.mrf.mxu1 }
 0x125   : > { %v1063_v19 = vpop.f32.mrf.mxu1 }
 0x127   : > { %v1065_v21 = vpop.f32.mrf.mxu1 }
 0x129   : > { %v5429_v23 = vpop.f32.mrf.mxu1 }
 0x12b   : > { %v5431_v24 = vpop.f32.mrf.mxu1 }
 0x12d   : > { %v5435_v20 = vpop.f32.mrf.mxu1 }
 0x12f   : > { %v5437_v25 = vpop.f32.mrf.mxu1 }
 0x131   : > { %v5450_v30 = vpop.f32.mrf.mxu1 }
 0x133   : > { %v5456_v33 = vpop.f32.mrf.mxu1 }
 0x135   : > { %v5462_v36 = vpop.f32.mrf.mxu1 }
 0x136   : > { %v936_v35 = vpop.f32.mrf.mxu0 }
 0x137   : > { %v5465_v39 = vpop.f32.mrf.mxu1  ;;  %v937_v40 = vadd.f32 %v936_v35, %v5460_v34 }
 0x138   : > { %v938_v37 = vpop.f32.mrf.mxu0 }
 0x139   : > { %v939_v38 = vadd.f32 %v938_v37, %v5454_v32  ;;  %v5469_v43 = vpop.f32.mrf.mxu1  ;;  %v1050_v49 = vadd.f32 %v1049_v13, %v937_v40 }
 0x13a   : > { %v940_v42 = vpop.f32.mrf.mxu0 }
 0x13b   : > { %v941_v41 = vadd.f32 %v940_v42, %v5460_v34  ;;  %v1052_v55 = vadd.f32 %v1051_v14, %v939_v38  ;;  %v5472_v48 = vpop.f32.mrf.mxu1  ;;  %v1322_v57 = vmax.f32 %v1050_v49, 0.0 }
 0x13c   : > { %v942_v45 = vpop.f32.mrf.mxu0 }
 0x13d   : > { %v1054_v2 = vadd.f32 %v1053_v15, %v941_v41  ;;  %v943_v47 = vadd.f32 %v942_v45, %v5454_v32  ;;  %v5474_v50 = vpop.f32.mrf.mxu1  ;;  %v1323_v52 = vmax.f32 %v1052_v55, 0.0  ;;  %v4468_v15 = vld [vmem:[%s6454_s3 + $0x200] ss:$12 sps:$4 sm:$0xff]   ;;  %v4472_v45 = vld [vmem:[%s6454_s3 + $0x1e8] ss:$12 sps:$4 sm:$0xff]  }
 0x13e   : > { %v946_v16 = vpop.f32.mrf.mxu0 }
 0x13f   : > { %v1056_v31 = vadd.f32 %v1055_v17, %v943_v47  ;;  %v1325_v44 = vmax.f32 %v1054_v2, 0.0  ;;  %v5477_v56 = vpop.f32.mrf.mxu1  ;;  %v947_v58 = vadd.f32 %v946_v16, %v5460_v34 }
 0x140   : > { %v948_v51 = vpop.f32.mrf.mxu0 }
 0x141   : > { %v1326_v53 = vmax.f32 %v1056_v31, 0.0  ;;  %v949_v54 = vadd.f32 %v948_v51, %v5454_v32  ;;  %v5483_v63 = vpop.f32.mrf.mxu1  ;;  %v5485_v1 = vpack.c.bf16 %v1325_v44, %v1322_v57  ;;  %v1060_v10 = vadd.f32 %v1059_v46, %v947_v58 }
 0x142   : > { %v950_v60 = vpop.f32.mrf.mxu0 }
 0x143   : > { %v951_v61 = vadd.f32 %v950_v60, %v5460_v34  ;;  %v5481_v62 = vpack.c.bf16 %v1326_v53, %v1323_v52  ;;  %v1062_v6 = vadd.f32 %v1061_v18, %v949_v54  ;;  %v5494_v9 = vpop.f32.mrf.mxu1  ;;  %v1328_v46 = vmax.f32 %v1060_v10, 0.0 }
 0x144   : > { %v952_v3 = vpop.f32.mrf.mxu0 }
 0x145   : > { %v1064_v7 = vadd.f32 %v1063_v19, %v951_v61  ;;  %v953_v8 = vadd.f32 %v952_v3, %v5454_v32  ;;  %1953 = vmatprep.mubr.bf16.mxu1 %v5481_v62  ;;  %v5497_v13 = vpop.f32.mrf.mxu1  ;;  %v1329_v17 = vmax.f32 %v1062_v6, 0.0 }
 0x146   : > { %v956_v11 = vpop.f32.mrf.mxu0  ;;  %1954 = vmatmul.mubr.bf16.vlgmr.msra.gmra.mxu1 %v5485_v1 }
 0x147   : > { %v1066_v12 = vadd.f32 %v1065_v21, %v953_v8  ;;  %4192 = vmatpush3.bf16.msra.mxu1 %v1919_v4  ;;  %v1331_v59 = vmax.f32 %v1064_v7, 0.0  ;;  %v5503_v22 = vpop.f32.mrf.mxu1  ;;  %v957_v35 = vadd.f32 %v956_v11, %v5460_v34  ;;  %v4480_v7 = vld [vmem:[%s6454_s3 + $0x1b8] ss:$12 sps:$4 sm:$0xff]  }
 0x148   : > { %v958_v14 = vpop.f32.mrf.mxu0  ;;  %4193 = vmatprep.subr.bf16.mxu1 %v4464_v5 }
 0x149   : > { %v1332_v18 = vmax.f32 %v1066_v12, 0.0  ;;  %v959_v19 = vadd.f32 %v958_v14, %v5454_v32  ;;  %v5509_v40 = vpop.f32.mrf.mxu1  ;;  %v5511_v41 = vpack.c.bf16 %v1331_v59, %v1328_v46  ;;  %v1070_v16 = vadd.f32 %v5429_v23, %v957_v35 }
 0x14a   : > { %v960_v21 = vpop.f32.mrf.mxu0 }
 0x14b   : > { %v961_v37 = vadd.f32 %v960_v21, %v5460_v34  ;;  %v5507_v38 = vpack.c.bf16 %v1332_v18, %v1329_v17  ;;  %4194 = vmatpush3.bf16.msra.mxu1 %v4464_v5  ;;  %v1072_v55 = vadd.f32 %v5431_v24, %v959_v19  ;;  %v5520_v49 = vpop.f32.mrf.mxu1  ;;  %v1334_v58 = vmax.f32 %v1070_v16, 0.0  ;;  %v4488_v16 = vld [vmem:[%s6454_s3 + $0x188] ss:$12 sps:$4 sm:$0xff]  }
 0x14c   : > { %v962_v42 = vpop.f32.mrf.mxu0  ;;  %4195 = vmatprep.subr.bf16.mxu1 %v4468_v15 }
 0x14d   : > { %v1074_v2 = vadd.f32 %v5435_v20, %v961_v37  ;;  %v963_v47 = vadd.f32 %v962_v42, %v5454_v32  ;;  %1963 = vmatprep.mubr.bf16.mxu1 %v5507_v38  ;;  %v5525_v51 = vpop.f32.mrf.mxu1  ;;  %v4476_v20 = vld [vmem:[%s6454_s3 + $0x1d0] ss:$12 sps:$4 sm:$0xff]   ;;  %v1335_v53 = vmax.f32 %v1072_v55, 0.0 }
 0x14e   : > { %v966_v31 = vpop.f32.mrf.mxu0  ;;  %1964 = vmatmul.mubr.bf16.gmra.mxu1 %v5511_v41 }
 0x14f   : > { %v1076_v44 = vadd.f32 %v5437_v25, %v963_v47  ;;  %4196 = vmatpush3.bf16.msra.mxu1 %v4468_v15  ;;  %v1337_v52 = vmax.f32 %v1074_v2, 0.0  ;;  %v5531_v23 = vpop.f32.mrf.mxu1  ;;  %v967_v60 = vadd.f32 %v966_v31, %v5460_v34 }
 0x150   : > { %v968_v24 = vpop.f32.mrf.mxu0  ;;  %4197 = vmatprep.subr.bf16.mxu1 %v4472_v45 }
 0x151   : > { %v1338_v54 = vmax.f32 %v1076_v44, 0.0  ;;  %v969_v57 = vadd.f32 %v968_v24, %v5454_v32  ;;  %v5537_v4 = vpop.f32.mrf.mxu1  ;;  %v5539_v6 = vpack.c.bf16 %v1337_v52, %v1334_v58  ;;  %v1080_v59 = vadd.f32 %v5450_v30, %v967_v60 }
 0x152   : > { %v970_v25 = vpop.f32.mrf.mxu0 }
 0x153   : > { %v971_v61 = vadd.f32 %v970_v25, %v5460_v34  ;;  %v5535_v3 = vpack.c.bf16 %v1338_v54, %v1335_v53  ;;  %4198 = vmatpush3.bf16.msra.mxu1 %v4472_v45  ;;  %v1082_v8 = vadd.f32 %v5456_v33, %v969_v57  ;;  %v5548_v12 = vpop.f32.mrf.mxu1  ;;  %v1340_v21 = vmax.f32 %v1080_v59, 0.0 }
 0x154   : > { %v972_v5 = vpop.f32.mrf.mxu0  ;;  %4199 = vmatprep.subr.bf16.mxu1 %v4476_v20 }
 0x155   : > { %v1084_v10 = vadd.f32 %v5462_v36, %v971_v61  ;;  %v973_v11 = vadd.f32 %v972_v5, %v5454_v32  ;;  %1973 = vmatprep.mubr.bf16.mxu1 %v5535_v3  ;;  %v5553_v17 = vpop.f32.mrf.mxu1  ;;  %v4484_v36 = vld [vmem:[%s6454_s3 + $0x1a0] ss:$12 sps:$4 sm:$0xff]   ;;  %v1341_v19 = vmax.f32 %v1082_v8, 0.0 }
 0x156   : > { %v976_v14 = vpop.f32.mrf.mxu0  ;;  %1974 = vmatmul.mubr.bf16.gmra.mxu1 %v5539_v6 }
 0x157   : > { %v1086_v15 = vadd.f32 %v5465_v39, %v973_v11  ;;  %4200 = vmatpush3.bf16.msra.mxu1 %v4476_v20  ;;  %v1343_v18 = vmax.f32 %v1084_v10, 0.0  ;;  %v5559_v30 = vpop.f32.mrf.mxu1  ;;  %v977_v37 = vadd.f32 %v976_v14, %v5460_v34 }
 0x158   : > { %v978_v33 = vpop.f32.mrf.mxu0  ;;  %4201 = vmatprep.subr.bf16.mxu1 %v4480_v7 }
 0x159   : > { %v1344_v46 = vmax.f32 %v1086_v15, 0.0  ;;  %v979_v35 = vadd.f32 %v978_v33, %v5454_v32  ;;  %v5565_v55 = vpop.f32.mrf.mxu1  ;;  %v5567_v47 = vpack.c.bf16 %v1343_v18, %v1340_v21  ;;  %v1090_v20 = vadd.f32 %v5469_v43, %v977_v37 }
 0x15a   : > { %v980_v39 = vpop.f32.mrf.mxu0 }
 0x15b   : > { %v981_v42 = vadd.f32 %v980_v39, %v5460_v34  ;;  %v5563_v45 = vpack.c.bf16 %v1344_v46, %v1341_v19  ;;  %4202 = vmatpush3.bf16.msra.mxu1 %v4480_v7  ;;  %v1092_v31 = vadd.f32 %v5472_v48, %v979_v35  ;;  %v5576_v24 = vpop.f32.mrf.mxu1  ;;  %v1346_v5 = vmax.f32 %v1090_v20, 0.0 }
 0x15c   : > { %v982_v2 = vpop.f32.mrf.mxu0  ;;  %4203 = vmatprep.subr.bf16.mxu1 %v4484_v36 }
 0x15d   : > { %v1094_v44 = vadd.f32 %v5474_v50, %v981_v42  ;;  %v983_v52 = vadd.f32 %v982_v2, %v5454_v32  ;;  %1983 = vmatprep.mubr.bf16.mxu1 %v5563_v45  ;;  %v5581_v57 = vpop.f32.mrf.mxu1  ;;  %v1347_v50 = vmax.f32 %v1092_v31, 0.0 }
 0x15e   : > { %v986_v53 = vpop.f32.mrf.mxu0  ;;  %1984 = vmatmul.mubr.bf16.gmra.mxu1 %v5567_v47 }
 0x15f   : > { %v1096_v54 = vadd.f32 %v5477_v56, %v983_v52  ;;  %4204 = vmatpush3.bf16.msra.mxu1 %v4484_v36  ;;  %v1349_v58 = vmax.f32 %v1094_v44, 0.0  ;;  %v5584_v61 = vpop.f32.mrf.mxu1  ;;  %v987_v43 = vadd.f32 %v986_v53, %v5460_v34 }
 0x160   : > { %v988_v48 = vpop.f32.mrf.mxu0  ;;  %4205 = vmatprep.subr.bf16.mxu1 %v4488_v16 }
 0x161   : > { %v1350_v60 = vmax.f32 %v1096_v54, 0.0  ;;  %v989_v25 = vadd.f32 %v988_v48, %v5454_v32  ;;  %v3941_v56 = vpop.f32.mrf.mxu1  ;;  %v5590_v59 = vpack.c.bf16 %v1349_v58, %v1346_v5  ;;  %v1100_v36 = vadd.f32 %v5483_v63, %v987_v43 }
 0x162   : > { %v990_v7 = vpop.f32.mrf.mxu0 }
 0x163   : > { %v991_v8 = vadd.f32 %v990_v7, %v5460_v34  ;;  %v5588_v10 = vpack.c.bf16 %v1350_v60, %v1347_v50  ;;  %4206 = vmatpush3.bf16.msra.mxu1 %v4488_v16  ;;  %v1102_v14 = vadd.f32 %v5494_v9, %v989_v25  ;;  %v3942_v33 = vpop.f32.mrf.mxu1  ;;  %v1352_v2 = vmax.f32 %v1100_v36, 0.0 }
 0x164   : > { %v992_v11 = vpop.f32.mrf.mxu0 }
 0x165   : > { %v1104_v15 = vadd.f32 %v5497_v13, %v991_v8  ;;  %v993_v18 = vadd.f32 %v992_v11, %v5454_v32  ;;  %1993 = vmatprep.mubr.bf16.mxu1 %v5588_v10  ;;  %v3944_v35 = vpop.f32.mrf.mxu1  ;;  %v1353_v39 = vmax.f32 %v1102_v14, 0.0  ;;  %v5614_v8 = vsub.s32 2, %v5433_v26 }
 0x166   : > { %v996_v19 = vpop.f32.mrf.mxu0  ;;  %1994 = vmatmul.mubr.bf16.gmra.mxu1 %v5590_v59 }
 0x167   : > { %v1106_v46 = vadd.f32 %v5503_v22, %v993_v18  ;;  %v1355_v21 = vmax.f32 %v1104_v15, 0.0  ;;  %v3945_v13 = vpop.f32.mrf.mxu1  ;;  %v997_v16 = vadd.f32 %v996_v19, %v5460_v34  ;;  %v5623_v26 = vrot.slane %v5448_v29, %v5614_v8 }
 0x168   : > { %v998_v37 = vpop.f32.mrf.mxu0  ;;  %v3940_v29 = vadd.f32 %v5584_v61, %v5581_v57 }
 0x169   : > { %v1356_v42 = vmax.f32 %v1106_v46, 0.0  ;;  %v999_v9 = vadd.f32 %v998_v37, %v5454_v32  ;;  %v3947_v52 = vpop.f32.mrf.mxu1  ;;  %v5604_v53 = vpack.c.bf16 %v1355_v21, %v1352_v2  ;;  %v1110_v50 = vadd.f32 %v5509_v40, %v997_v16 }
 0x16a   : > { %v1000_v31 = vpop.f32.mrf.mxu0  ;;  %v3946_v46 = vadd.f32 %v3945_v13, %v3944_v35  ;;  %v3943_v35 = vadd.f32 %v3942_v33, %v3941_v56  ;;  %v1166_v57 = vadd.f32 %v3940_v29, %v5623_v26 }
 0x16b   : > { %v1001_v44 = vadd.f32 %v1000_v31, %v5460_v34  ;;  %v5602_v63 = vpack.c.bf16 %v1356_v42, %v1353_v39  ;;  %v1112_v22 = vadd.f32 %v5520_v49, %v999_v9  ;;  %v3948_v48 = vpop.f32.mrf.mxu1  ;;  %v1358_v15 = vmax.f32 %v1110_v50, 0.0 }
 0x16c   : > { %v1002_v20 = vpop.f32.mrf.mxu0  ;;  %v3937_v39 = vadd.f32 %v5576_v24, %v5565_v55 }
 0x16d   : > { %v1114_v54 = vadd.f32 %v5525_v51, %v1001_v44  ;;  %v1003_v58 = vadd.f32 %v1002_v20, %v5454_v32  ;;  %2003 = vmatprep.mubr.bf16.mxu1 %v5602_v63  ;;  %v3950_v5 = vpop.f32.mrf.mxu1  ;;  %v1359_v49 = vmax.f32 %v1112_v22, 0.0  ;;  %v3949_v44 = vadd.f32 %v3948_v48, %v3947_v52 }
 0x16e   : > { %v1006_v60 = vpop.f32.mrf.mxu0  ;;  %2004 = vmatmul.mubr.bf16.gmra.mxu1 %v5604_v53  ;;  %v1163_v56 = vadd.f32 %v3937_v39, %v5623_v26  ;;  %v1171_v22 = vadd.f32 %v3943_v35, %v5623_v26  ;;  %v4491_v35 = vld [vmem:[%s6454_s3 + $0x158] ss:$12 sps:$4 sm:$0xff]  }
 0x16f   : > { %v1116_v25 = vadd.f32 %v5531_v23, %v1003_v58  ;;  %v1361_v43 = vmax.f32 %v1114_v54, 0.0  ;;  %v3951_v14 = vpop.f32.mrf.mxu1  ;;  %v1007_v18 = vadd.f32 %v1006_v60, %v5460_v34 }
 0x170   : > { %v1008_v7 = vpop.f32.mrf.mxu0  ;;  %v3952_v52 = vadd.f32 %v3951_v14, %v3950_v5  ;;  %v4490_v5 = vld [vmem:[%s6454_s3 + $0xb0] ss:$12 sps:$4 sm:$0xff]  }
 0x171   : > { %v1362_v51 = vmax.f32 %v1116_v25, 0.0  ;;  %v1009_v11 = vadd.f32 %v1008_v7, %v5454_v32  ;;  %v3953_v23 = vpop.f32.mrf.mxu1  ;;  %v5625_v37 = vpack.c.bf16 %v1361_v43, %v1358_v15  ;;  %v1120_v13 = vadd.f32 %v5537_v4, %v1007_v18 }
 0x172   : > { %v1010_v40 = vpop.f32.mrf.mxu0 }
 0x173   : > { %v1011_v36 = vadd.f32 %v1010_v40, %v5460_v34  ;;  %v5619_v19 = vpack.c.bf16 %v1362_v51, %v1359_v49  ;;  %v1122_v42 = vadd.f32 %v5548_v12, %v1009_v11  ;;  %v3954_v2 = vpop.f32.mrf.mxu1  ;;  %v1364_v4 = vmax.f32 %v1120_v13, 0.0 }
 0x174   : > { %v1012_v21 = vpop.f32.mrf.mxu0  ;;  %v3955_v54 = vadd.f32 %v3954_v2, %v3953_v23  ;;  %v1179_v51 = vadd.f32 %v3949_v44, %v5623_v26  ;;  %v1182_v2 = vadd.f32 %v3952_v52, %v5623_v26 }
 0x175   : > { %v1124_v9 = vadd.f32 %v5553_v17, %v1011_v36  ;;  %v1013_v34 = vadd.f32 %v1012_v21, %v5454_v32  ;;  %2013 = vmatprep.mubr.bf16.mxu1 %v5619_v19  ;;  %v3956_v24 = vpop.f32.mrf.mxu1  ;;  %v1174_v17 = vadd.f32 %v3946_v46, %v5623_v26  ;;  %v1365_v32 = vmax.f32 %v1122_v42, 0.0 }
 0x176   : > { %v4177_v16 = vpop.f32.mrf.mxu0  ;;  %2014 = vmatmul.mubr.bf16.gmra.mxu1 %v5625_v37  ;;  %v1187_v15 = vadd.f32 %v3955_v54, %v5623_v26 }
 0x177   : > { %v1126_v55 = vadd.f32 %v5559_v30, %v1013_v34  ;;  %v1367_v12 = vmax.f32 %v1124_v9, 0.0  ;;  %v3957_v33 = vpop.f32.mrf.mxu1  ;;  %v1268_v11 = vadd.f32 %v4177_v16, %v1171_v22 }
 0x178   : > { %v1259_v31 = vpop.f32.mrf.mxu0  ;;  %v3958_v30 = vadd.f32 %v3957_v33, %v3956_v24 }
 0x179   : > { %v1368_v20 = vmax.f32 %v1126_v55, 0.0  ;;  %v1260_v50 = vadd.f32 %v1259_v31, %v1163_v56  ;;  %v3959_v60 = vpop.f32.mrf.mxu1  ;;  %v5644_v7 = vpack.c.bf16 %v1367_v12, %v1364_v4  ;;  %v1330_v13 = vmax.f32 %v1268_v11, 0.0  ;;  %v4493_v4 = vld [vmem:[%s6454_s3 + $0x140] ss:$12 sps:$4 sm:$0xff]   ;;  %v4495_v11 = vld [vmem:[%s6454_s3 + $0x128] ss:$12 sps:$4 sm:$0xff]  }
 0x17a   : > { %v4178_v58 = vpop.f32.mrf.mxu0  ;;  %v1190_v46 = vadd.f32 %v3958_v30, %v5623_v26 }
 0x17b   : > { %v5642_v61 = vpack.c.bf16 %v1368_v20, %v1365_v32  ;;  %v1271_v25 = vadd.f32 %v4178_v58, %v1174_v17  ;;  %v3960_v49 = vpop.f32.mrf.mxu1  ;;  %v1324_v40 = vmax.f32 %v1260_v50, 0.0  ;;  %v4492_v17 = vld [vmem:[%s6454_s3 + $0x98] ss:$12 sps:$4 sm:$0xff]  }
 0x17c   : > { %v1262_v43 = vpop.f32.mrf.mxu0  ;;  %v3961_v42 = vadd.f32 %v3960_v49, %v3959_v60 }
 0x17d   : > { %v1263_v48 = vadd.f32 %v1262_v43, %v1166_v57  ;;  %2023 = vmatprep.mubr.bf16.mxu1 %v5642_v61  ;;  %v3962_v23 = vpop.f32.mrf.mxu1  ;;  %v1333_v21 = vmax.f32 %v1271_v25, 0.0  ;;  %v4494_v43 = vld [vmem:[%s6454_s3 + $0x80] ss:$12 sps:$4 sm:$0xff]  }
 0x17e   : > { %2024 = vmatmul.mubr.bf16.gmra.mxu1 %v5644_v7  ;;  %v4181_v18 = vpop.f32.mrf.mxu0  ;;  %v1195_v33 = vadd.f32 %v3961_v42, %v5623_v26 }
 0x17f   : > { %v1327_v36 = vmax.f32 %v1263_v48, 0.0  ;;  %v3963_v34 = vpop.f32.mrf.mxu1  ;;  %v1284_v16 = vadd.f32 %v4181_v18, %v1187_v15  ;;  %v1375_v12 = vpack.c.bf16 %v1333_v21, %v1330_v13 }
 0x180   : > { %v1275_v39 = vpop.f32.mrf.mxu0  ;;  %v3964_v44 = vadd.f32 %v3963_v34, %v3962_v23 }
 0x181   : > { %v1372_v14 = vpack.c.bf16 %v1327_v36, %v1324_v40  ;;  %v1276_v9 = vadd.f32 %v1275_v39, %v1179_v51  ;;  %v3965_v24 = vpop.f32.mrf.mxu1  ;;  %v1342_v22 = vmax.f32 %v1284_v16, 0.0  ;;  %v4496_v39 = vld [vmem:[%s6454_s3 + $0x68] ss:$12 sps:$4 sm:$0xff]  }
 0x182   : > { %v4182_v29 = vpop.f32.mrf.mxu0  ;;  %v1198_v51 = vadd.f32 %v3964_v44, %v5623_v26  ;;  %v4499_v44 = vld [vmem:[%s6454_s3 + $0xf8] ss:$12 sps:$4 sm:$0xff]  }
 0x183   : > { %3809 = vmatmul.mubr.msk.bf16.vlgmr.msra.gmra.mxu0 %vm867_vm1, %v1372_v14  ;;  %4207 = vmatprep.mubr.msk.bf16.mxu1 %vm867_vm1, %v1372_v14  ;;  %v1287_v55 = vadd.f32 %v4182_v29, %v1190_v46  ;;  %v1336_v32 = vmax.f32 %v1276_v9, 0.0  ;;  %v3966_v56 = vpop.f32.mrf.mxu1  ;;  %v4497_v9 = vld [vmem:[%s6454_s3 + $0x110] ss:$12 sps:$4 sm:$0xff]  }
 0x184   : > { %4000 = vmatpush3.bf16.msra.mxu0 %v4490_v5  ;;  %v1278_v31 = vpop.f32.mrf.mxu0  ;;  %2076 = vmatprep.mubr.bf16.mxu0 %v4746_v0  ;;  %v3967_v58 = vadd.f32 %v3966_v56, %v3965_v24 }
 0x185   : > { %v1279_v20 = vadd.f32 %v1278_v31, %v1182_v2  ;;  %4001 = vmatprep.subr.bf16.mxu0 %v4491_v35  ;;  %v1345_v54 = vmax.f32 %v1287_v55, 0.0  ;;  %v3968_v30 = vpop.f32.mrf.mxu1  ;;  %v4498_v31 = vld [vmem:[%s6454_s3 + $0x50] ss:$12 sps:$4 sm:$0xff]  }
 0x186   : > { %4208 = vmatmul.mubr.msk.bf16.vlgmr.msra.gmra.mxu1 %vm867_vm1, %v1375_v12  ;;  %v4185_v50 = vpop.f32.mrf.mxu0  ;;  %v1203_v60 = vadd.f32 %v3967_v58, %v5623_v26 }
 0x187   : > { %v1339_v57 = vmax.f32 %v1279_v20, 0.0  ;;  %v3969_v49 = vpop.f32.mrf.mxu1  ;;  %v5677_v15 = vpack.c.bf16 %v1345_v54, %v1342_v22 }
 0x188   : > { %v1291_v25 = vpop.f32.mrf.mxu0  ;;  %4002 = vmatpush3.bf16.msra.mxu0 %v4492_v17  ;;  %v1300_v18 = vadd.f32 %v4185_v50, %v1203_v60  ;;  %v3970_v40 = vadd.f32 %v3969_v49, %v3968_v30  ;;  %v4500_v50 = vld [vmem:[%s6454_s3 + $0x38] ss:$12 sps:$4 sm:$0xff]   ;;  %v4501_v30 = vld [vmem:[%s6454_s3 + $0xe0] ss:$12 sps:$4 sm:$0xff]  }
 0x189   : > { %v1378_v52 = vpack.c.bf16 %v1339_v57, %v1336_v32  ;;  %v1292_v48 = vadd.f32 %v1291_v25, %v1195_v33  ;;  %4003 = vmatprep.subr.bf16.mxu0 %v4493_v4  ;;  %v3971_v23 = vpop.f32.mrf.mxu1 }
 0x18a   : > { %v4186_v36 = vpop.f32.mrf.mxu0  ;;  %v1206_v46 = vadd.f32 %v3970_v40, %v5623_v26  ;;  %v1354_v34 = vmax.f32 %v1300_v18, 0.0 }
 0x18b   : > { %3810 = vmatmul.mubr.msk.bf16.gmra.mxu0 %vm867_vm1, %v1375_v12  ;;  %4211 = vmatprep.mubr.msk.bf16.mxu1 %vm867_vm1, %v1378_v52  ;;  %v1348_v5 = vmax.f32 %v1292_v48, 0.0  ;;  %v3972_v42 = vpop.f32.mrf.mxu1 }
 0x18c   : > { %v1294_v21 = vpop.f32.mrf.mxu0  ;;  %2086 = vmatprep.mubr.bf16.mxu0 %v4746_v0  ;;  %4004 = vmatpush3.bf16.msra.mxu0 %v4494_v43  ;;  %v1303_v2 = vadd.f32 %v4186_v36, %v1206_v46  ;;  %v3973_v35 = vadd.f32 %v3972_v42, %v3971_v23  ;;  %v4503_v23 = vld [vmem:[%s6454_s3 + $0xc8] ss:$12 sps:$4 sm:$0xff]  }
 0x18d   : > { %v1295_v14 = vadd.f32 %v1294_v21, %v1198_v51  ;;  %4005 = vmatprep.subr.bf16.mxu0 %v4495_v11  ;;  %v3974_v29 = vpop.f32.mrf.mxu1  ;;  %v4502_v11 = vld [vmem:[%s6454_s3 + $0x20] ss:$12 sps:$4 sm:$0xff]   ;;  %v4504_v21 = vld [vmem:[%s6454_s3 + $0x8] ss:$12 sps:$4 sm:$0xff]  }
 0x18e   : > { %4212 = vmatmul.mubr.msk.bf16.gmra.mxu1 %vm867_vm1, %v5677_v15  ;;  %v4189_v13 = vpop.f32.mrf.mxu0  ;;  %v1357_v55 = vmax.f32 %v1303_v2, 0.0  ;;  %v1211_v24 = vadd.f32 %v3973_v35, %v5623_v26  ;;  %v4511_v2 = vld [vmem:[%s6456_s5 + $0x78] ss:$12 sps:$4 sm:$0xff]  }
 0x18f   : > { %v1351_v16 = vmax.f32 %v1295_v14, 0.0  ;;  %v3975_v32 = vpop.f32.mrf.mxu1  ;;  %v4507_v14 = vld [vmem:[%s6456_s5 + $0xac] ss:$12 sps:$4 sm:$0xff]  }
 0x190   : > { %v1307_v12 = vpop.f32.mrf.mxu0  ;;  %4006 = vmatpush3.bf16.msra.mxu0 %v4496_v39  ;;  %v1387_v20 = vpack.c.bf16 %v1357_v55, %v1354_v34  ;;  %v3976_v56 = vadd.f32 %v3975_v32, %v3974_v29  ;;  %v4508_v34 = vld [vmem:[%s6456_s5 + $0x90] ss:$12 sps:$4 sm:$0xff]   ;;  %v4519_v35 = vld [vmem:[%s6456_s5 + $0x4c] ss:$12 sps:$4 sm:$0xff]   ;;  %v4541_v32 = vld [vmem:[%s6456_s5 + $0x108] ss:$12 sps:$4 sm:$0xff]  }
 0x191   : > { %v1384_v17 = vpack.c.bf16 %v1351_v16, %v1348_v5  ;;  %4007 = vmatprep.subr.bf16.mxu0 %v4497_v9  ;;  %v1308_v33 = vadd.f32 %v1307_v12, %v1211_v24  ;;  %v3977_v22 = vpop.f32.mrf.mxu1  ;;  %v4510_v9 = vld [vmem:[%s6456_s5 + $0x94] ss:$12 sps:$4 sm:$0xff]   ;;  %v4525_v16 = vld [vmem:[%s6456_s5 + $0x1c] ss:$12 sps:$4 sm:$0xff]   ;;  %v4523_v29 = vld [vmem:[%s6456_s5 + $0x18] ss:$12 sps:$4 sm:$0xff]  }
 0x192   : > { %v4190_v4 = vpop.f32.mrf.mxu0  ;;  %v1214_v54 = vadd.f32 %v3976_v56, %v5623_v26  ;;  %v4531_v55 = vld [vmem:[%s6456_s5 + $0x16c] ss:$12 sps:$4 sm:$0xff]   ;;  %v4529_v24 = vld [vmem:[%s6456_s5 + $0x168] ss:$12 sps:$4 sm:$0xff]  }
 0x193   : > { %3811 = vmatmul.mubr.msk.bf16.gmra.mxu0 %vm867_vm1, %v1378_v52  ;;  %4215 = vmatprep.mubr.msk.bf16.mxu1 %vm867_vm1, %v1384_v17  ;;  %v3978_v57 = vpop.f32.mrf.mxu1  ;;  %v1360_v25 = vmax.f32 %v1308_v33, 0.0  ;;  %v4537_v12 = vld [vmem:[%s6456_s5 + $0x13c] ss:$12 sps:$4 sm:$0xff]  }
 0x194   : > { %2096 = vmatprep.mubr.bf16.mxu0 %v4746_v0  ;;  %v1310_v58 = vpop.f32.mrf.mxu0  ;;  %4008 = vmatpush3.bf16.msra.mxu0 %v4498_v31  ;;  %v3979_v60 = vadd.f32 %v3978_v57, %v3977_v22  ;;  %v4535_v31 = vld [vmem:[%s6456_s5 + $0x138] ss:$12 sps:$4 sm:$0xff]   ;;  %v4549_v33 = vld [vmem:[%s6456_s5 + $0xdc] ss:$12 sps:$4 sm:$0xff]  }
 0x195   : > { %4009 = vmatprep.subr.bf16.mxu0 %v4499_v44  ;;  %v1311_v43 = vadd.f32 %v1310_v58, %v1214_v54  ;;  %v3980_v52 = vpop.f32.mrf.mxu1  ;;  %v4555_v44 = vld [vmem:[%s6456_s5 + $0x228] ss:$12 sps:$4 sm:$0x1f]   ;;  %v4552_v22 = vld [vmem:[%s6456_s5 + $0xc4] ss:$12 sps:$4 sm:$0xff]  }
 0x196   : > { %4216 = vmatmul.mubr.msk.bf16.gmra.mxu1 %vm867_vm1, %v1387_v20  ;;  %v1219_v48 = vadd.f32 %v3979_v60, %v5623_v26  ;;  %v2932_v56 = vsel %vm892_vm0, %v4555_v44, 0  ;;  %v4561_v54 = vld [vmem:[%s6456_s5 + $0x1fc] ss:$12 sps:$4 sm:$0xff]   ;;  %v4559_v58 = vld [vmem:[%s6456_s5 + $0x1f8] ss:$12 sps:$4 sm:$0xff]  }
 0x197   : > { %v1363_v49 = vmax.f32 %v1311_v43, 0.0  ;;  %v3981_v51 = vpop.f32.mrf.mxu1  ;;  %v5868_v57 = vld [vmem:[%s6456_s5 + $0x230] ss:$12 sps:$4 sm:$0x1f]   ;;  %v4569_v60 = vld [vmem:[%s6456_s5 + $0x1cc] ss:$12 sps:$4 sm:$0xff]  }
 0x198   : > { %4010 = vmatpush3.bf16.msra.mxu0 %v4500_v50  ;;  %v1316_v18 = vadd.f32 %v4189_v13, %v1219_v48  ;;  %v3982_v40 = vadd.f32 %v3981_v51, %v3980_v52  ;;  %v4517_v13 = vld [vmem:[%s6456_s5 + $0x48] ss:$12 sps:$4 sm:$0xff]   ;;  %v4550_v50 = vld [vmem:[%s6456_s5 + $0xc0] ss:$12 sps:$4 sm:$0xff]   ;;  %v4571_v48 = vld [vmem:[%s6456_s5 + $0x1b0] ss:$12 sps:$4 sm:$0xff]  }
 0x199   : > { %4011 = vmatprep.subr.bf16.mxu0 %v4501_v30  ;;  %v1390_v36 = vpack.c.bf16 %v1363_v49, %v1360_v25  ;;  %v4563_v30 = vld [vmem:[%s6456_s5 + $0x1e0] ss:$12 sps:$4 sm:$0xff]   ;;  %v4567_v25 = vld [vmem:[%s6456_s5 + $0x1c8] ss:$12 sps:$4 sm:$0xff]  }
 0x19a   : > { %v1222_v46 = vadd.f32 %v3982_v40, %v5623_v26  ;;  %v1366_v39 = vmax.f32 %v1316_v18, 0.0  ;;  %v4505_v26 = vld [vmem:[%s6456_s5 + $0xa8] ss:$12 sps:$4 sm:$0xff]   ;;  %v4575_v18 = vld [vmem:[%s6456_s5 + $0x198] ss:$12 sps:$4 sm:$0xff]  }
 0x19b   : > { %3812 = vmatmul.mubr.msk.bf16.gmra.mxu0 %vm867_vm1, %v5677_v15  ;;  %4219 = vmatprep.mubr.msk.bf16.mxu1 %vm867_vm1, %v1390_v36  ;;  %v4573_v52 = vld [vmem:[%s6456_s5 + $0x1b4] ss:$12 sps:$4 sm:$0xff]  }
 0x19c   : > { %2106 = vmatprep.mubr.bf16.mxu0 %v4746_v0  ;;  %4012 = vmatpush3.bf16.msra.mxu0 %v4502_v11  ;;  %v1319_v5 = vadd.f32 %v4190_v4, %v1222_v46  ;;  %v4547_v4 = vld [vmem:[%s6456_s5 + $0xd8] ss:$12 sps:$4 sm:$0xff]   ;;  %v4577_v11 = vld [vmem:[%s6456_s5 + $0x19c] ss:$12 sps:$4 sm:$0xff]  }
 0x19d   : > { %4013 = vmatprep.subr.bf16.mxu0 %v4503_v23  ;;  %v4579_v23 = vld [vmem:[%s6456_s5 + $0x180] ss:$12 sps:$4 sm:$0xff]  }
 0x19e   : > { %v1369_v42 = vmax.f32 %v1319_v5, 0.0  ;;  %v4583_v5 = vld [vmem:[%s6456_s5 + $0x170] ss:$12 sps:$4 sm:$0xff]  }
 0x1a0   : > { %4014 = vmatpush3.bf16.msra.mxu0 %v4504_v21  ;;  %v1393_v15 = vpack.c.bf16 %v1369_v42, %v1366_v39 }
 0x1a1   : > { %2940 = vmatprep.subr.bf16.mxu0 %v4507_v14 }
 0x1a2   : > { %4220 = vmatmul.mubr.msk.bf16.gmra.mxu1 %vm867_vm1, %v1393_v15 }
 0x1a3   : > { %3813 = vmatmul.mubr.msk.bf16.gmra.mxu0 %vm867_vm1, %v1384_v17  ;;  %3085 = vmatprep.mubr.bf16.mxu1 %v4746_v0  ;;  %v4543_v17 = vld [vmem:[%s6456_s5 + $0x10c] ss:$12 sps:$4 sm:$0xff]  }
 0x1a4   : > { %2116 = vmatprep.mubr.bf16.mxu0 %v4746_v0 }
 0x1ab   : > { %3814 = vmatmul.mubr.msk.bf16.gmra.mxu0 %vm867_vm1, %v1387_v20  ;;  %v4544_v20 = vld [vmem:[%s6456_s5 + $0xf0] ss:$12 sps:$4 sm:$0xff]  }
 0x1ac   : > { %2126 = vmatprep.mubr.bf16.mxu0 %v4746_v0 }
 0x1b3   : > { %3815 = vmatmul.mubr.msk.bf16.gmra.mxu0 %vm867_vm1, %v1390_v36  ;;  %v4581_v36 = vld [vmem:[%s6456_s5 + $0x184] ss:$12 sps:$4 sm:$0xff]  }
 0x1b4   : > { %2136 = vmatprep.mubr.bf16.mxu0 %v4746_v0 }
 0x1bb   : > { %3816 = vmatmul.mubr.msk.bf16.gmra.mxu0 %vm867_vm1, %v1393_v15 }
 0x1bc   : > { %2179 = vmatprep.mubr.bf16.mxu0 %v5481_v62  ;;  %v4513_v62 = vld [vmem:[%s6456_s5 + $0x7c] ss:$12 sps:$4 sm:$0xff]  }
 0x1c3   : > { %2180 = vmatmul.mubr.bf16.vlgmr.msra.gmra.mxu0 %v5485_v1  ;;  %v4516_v1 = vld [vmem:[%s6456_s5 + $0x64] ss:$12 sps:$4 sm:$0xff]  }
 0x1c4   : > { %2187 = vmatprep.mubr.bf16.mxu0 %v5507_v38  ;;  %2941 = vmatpush1.bf16.msra.mxu0 %v4505_v26  ;;  %v4514_v38 = vld [vmem:[%s6456_s5 + $0x60] ss:$12 sps:$4 sm:$0xff]  }
 0x1c5   : > { %2942 = vmatprep.subr.bf16.mxu0 %v4510_v9 }
 0x1c8   : > { %2943 = vmatpush1.bf16.msra.mxu0 %v4508_v34 }
 0x1c9   : > { %2944 = vmatprep.subr.bf16.mxu0 %v4513_v62 }
 0x1cb   : > { %2188 = vmatmul.mubr.bf16.gmra.mxu0 %v5511_v41  ;;  %v4522_v41 = vld [vmem:[%s6456_s5 + $0x34] ss:$12 sps:$4 sm:$0xff]  }
 0x1cc   : > { %2195 = vmatprep.mubr.bf16.mxu0 %v5535_v3  ;;  %2945 = vmatpush1.bf16.msra.mxu0 %v4511_v2  ;;  %v4520_v3 = vld [vmem:[%s6456_s5 + $0x30] ss:$12 sps:$4 sm:$0xff]  }
 0x1cd   : > { %2946 = vmatprep.subr.bf16.mxu0 %v4516_v1 }
 0x1d0   : > { %2947 = vmatpush1.bf16.msra.mxu0 %v4514_v38  ;;  %v5920_v38 = vld [vmem:[%s6455_s4] sm:$0x7] }
 0x1d1   : > { %2948 = vmatprep.subr.bf16.mxu0 %v4519_v35 }
 0x1d3   : > { %2196 = vmatmul.mubr.bf16.gmra.mxu0 %v5539_v6  ;;  %v4528_v6 = vld [vmem:[%s6456_s5 + $0x4] ss:$12 sps:$4 sm:$0xff]  }
 0x1d4   : > { %2203 = vmatprep.mubr.bf16.mxu0 %v5563_v45  ;;  %2949 = vmatpush1.bf16.msra.mxu0 %v4517_v13  ;;  %v4526_v45 = vld [vmem:[%s6456_s5] ss:$12 sps:$4 sm:$0xff]   ;;  %v5926_v13 = vrot.slane %v5920_v38, %v5440_v27 }
 0x1d5   : > { %2950 = vmatprep.subr.bf16.mxu0 %v4522_v41  ;;  %v5930_v41 = vrot.slane %v5920_v38, %v5443_v28 }
 0x1d8   : > { %2951 = vmatpush1.bf16.msra.mxu0 %v4520_v3 }
 0x1d9   : > { %2952 = vmatprep.subr.bf16.mxu0 %v4525_v16 }
 0x1db   : > { %2204 = vmatmul.mubr.bf16.gmra.mxu0 %v5567_v47  ;;  %v4534_v47 = vld [vmem:[%s6456_s5 + $0x154] ss:$12 sps:$4 sm:$0xff]  }
 0x1dc   : > { %2211 = vmatprep.mubr.bf16.mxu0 %v5588_v10  ;;  %2953 = vmatpush1.bf16.msra.mxu0 %v4523_v29  ;;  %v4532_v10 = vld [vmem:[%s6456_s5 + $0x150] ss:$12 sps:$4 sm:$0xff]  }
 0x1dd   : > { %2954 = vmatprep.subr.bf16.mxu0 %v4528_v6 }
 0x1e0   : > { %2955 = vmatpush1.bf16.msra.mxu0 %v4526_v45 }
 0x1e1   : > { %2956 = vmatprep.subr.bf16.mxu0 %v4531_v55 }
 0x1e3   : > { %2212 = vmatmul.mubr.bf16.gmra.mxu0 %v5590_v59  ;;  %v4540_v59 = vld [vmem:[%s6456_s5 + $0x124] ss:$12 sps:$4 sm:$0xff]  }
 0x1e4   : > { %2219 = vmatprep.mubr.bf16.mxu0 %v5602_v63  ;;  %2957 = vmatpush2.bf16.msra.mxu0 %v4529_v24  ;;  %v4538_v63 = vld [vmem:[%s6456_s5 + $0x120] ss:$12 sps:$4 sm:$0xff]  }
 0x1e5   : > { %2958 = vmatprep.subr.bf16.mxu0 %v4534_v47 }
 0x1e8   : > { %2959 = vmatpush2.bf16.msra.mxu0 %v4532_v10 }
 0x1e9   : > { %2960 = vmatprep.subr.bf16.mxu0 %v4537_v12 }
 0x1eb   : > { %2220 = vmatmul.mubr.bf16.gmra.mxu0 %v5604_v53  ;;  %v4546_v53 = vld [vmem:[%s6456_s5 + $0xf4] ss:$12 sps:$4 sm:$0xff]  }
 0x1ec   : > { %2227 = vmatprep.mubr.bf16.mxu0 %v5619_v19  ;;  %2961 = vmatpush2.bf16.msra.mxu0 %v4535_v31  ;;  %v4553_v19 = vld [vmem:[%s6456_s5 + $0x22c] ss:$12 sps:$4 sm:$0x1f]  }
 0x1ed   : > { %2962 = vmatprep.subr.bf16.mxu0 %v4540_v59  ;;  %3897 = vmatprep.subr.msk.bf16.mxu1 %vm892_vm0, %v4553_v19 }
 0x1ee   : > { %3054 = vmatpush1.bf16.msra.mxu1 %v2932_v56 }
 0x1f0   : > { %2963 = vmatpush2.bf16.msra.mxu0 %v4538_v63 }
 0x1f1   : > { %2964 = vmatprep.subr.bf16.mxu0 %v4543_v17 }
 0x1f3   : > { %2228 = vmatmul.mubr.bf16.gmra.mxu0 %v5625_v37  ;;  %v4558_v37 = vld [vmem:[%s6456_s5 + $0x214] ss:$12 sps:$4 sm:$0xff]  }
 0x1f4   : > { %2235 = vmatprep.mubr.bf16.mxu0 %v5642_v61  ;;  %2965 = vmatpush2.bf16.msra.mxu0 %v4541_v32  ;;  %v4556_v61 = vld [vmem:[%s6456_s5 + $0x210] ss:$12 sps:$4 sm:$0xff]  }
 0x1f5   : > { %2966 = vmatprep.subr.bf16.mxu0 %v4546_v53  ;;  %3055 = vmatprep.subr.bf16.mxu1 %v4558_v37 }
 0x1f6   : > { %3056 = vmatpush1.bf16.msra.mxu1 %v4556_v61 }
 0x1f7   : > { %3057 = vmatprep.subr.bf16.mxu1 %v4561_v54 }
 0x1f8   : > { %2967 = vmatpush2.bf16.msra.mxu0 %v4544_v20 }
 0x1f9   : > { %2968 = vmatprep.subr.bf16.mxu0 %v4549_v33 }
 0x1fa   : > { %3058 = vmatpush1.bf16.msra.mxu1 %v4559_v58 }
 0x1fb   : > { %2236 = vmatmul.mubr.bf16.gmra.mxu0 %v5644_v7  ;;  %v4565_v7 = vld [vmem:[%s6456_s5 + $0x1e4] ss:$12 sps:$4 sm:$0xff]  }
 0x1fc   : > { %2969 = vmatpush2.bf16.msra.mxu0 %v4547_v4  ;;  %3059 = vmatprep.subr.bf16.mxu1 %v4565_v7  ;;  %v4566_v7 = vld [vmem:[%s6456_s5 + $0x218] ss:$12 sps:$4 sm:$0xff]  }
 0x1fd   : > { %2970 = vmatprep.subr.bf16.mxu0 %v4552_v22 }
 0x1fe   : > { %3060 = vmatpush1.bf16.msra.mxu1 %v4563_v30 }
 0x1ff   : > { %3061 = vmatprep.subr.bf16.mxu1 %v4569_v60 }
 0x200   : > { %2971 = vmatpush2.bf16.msra.mxu0 %v4550_v50  ;;  %v2938_v50 = vsel %vm892_vm0, %v5868_v57, 0 }
 0x201   : > { %4257 = vmatprep.subr.msk.bf16.mxu0 %vm892_vm0, %v5868_v57 }
 0x202   : > { %3062 = vmatpush1.bf16.msra.mxu1 %v4567_v25 }
 0x203   : > { %3063 = vmatprep.subr.bf16.mxu1 %v4573_v52 }
 0x206   : > { %v1955_v43 = vpop.f32.mrf.mxu1  ;;  %3064 = vmatpush1.bf16.msra.mxu1 %v4571_v48 }
 0x207   : > { %3065 = vmatprep.subr.bf16.mxu1 %v4577_v11  ;;  %v1956_v55 = vadd.f32 %v1955_v43, %v5930_v41  ;;  %v4570_v11 = vld [vmem:[%s6456_s5 + $0x200] ss:$12 sps:$4 sm:$0xff]  }
 0x208   : > { %v1957_v49 = vpop.f32.mrf.mxu1 }
 0x209   : > { %v1958_v6 = vadd.f32 %v1957_v49, %v5926_v13 }
 0x20a   : > { %v1959_v51 = vpop.f32.mrf.mxu1  ;;  %3066 = vmatpush1.bf16.msra.mxu1 %v4575_v18 }
 0x20b   : > { %3067 = vmatprep.subr.bf16.mxu1 %v4581_v36  ;;  %v1960_v45 = vadd.f32 %v1959_v51, %v5930_v41 }
 0x20c   : > { %v1961_v40 = vpop.f32.mrf.mxu1 }
 0x20d   : > { %v1962_v47 = vadd.f32 %v1961_v40, %v5926_v13 }
 0x20e   : > { %v1965_v46 = vpop.f32.mrf.mxu1  ;;  %3068 = vmatpush1.bf16.msra.mxu1 %v4579_v23 }
 0x20f   : > { %4079 = vmatprep.subr.bf16.mxu1 %v4583_v5  ;;  %v1966_v22 = vadd.f32 %v1965_v46, %v5930_v41 }
 0x210   : > { %v1967_v21 = vpop.f32.mrf.mxu1 }
 0x211   : > { %v1968_v37 = vadd.f32 %v1967_v21, %v5926_v13 }
 0x212   : > { %v1969_v39 = vpop.f32.mrf.mxu1 }
 0x213   : > { %v1970_v61 = vadd.f32 %v1969_v39, %v5930_v41 }
 0x214   : > { %v1971_v14 = vpop.f32.mrf.mxu1 }
 0x215   : > { %v1972_v30 = vadd.f32 %v1971_v14, %v5926_v13 }
 0x216   : > { %v5905_v42 = vpop.f32.mrf.mxu1 }
 0x217   : > { %v1976_v14 = vadd.f32 %v5905_v42, %v5930_v41 }
 0x218   : > { %v1977_v15 = vpop.f32.mrf.mxu1 }
 0x219   : > { %v1978_v21 = vadd.f32 %v1977_v15, %v5926_v13 }
 0x21a   : > { %v1979_v26 = vpop.f32.mrf.mxu1 }
 0x21b   : > { %v1980_v39 = vadd.f32 %v1979_v26, %v5930_v41 }
 0x21c   : > { %v5907_v9 = vpop.f32.mrf.mxu1 }
 0x21e   : > { %v5909_v34 = vpop.f32.mrf.mxu1 }
 0x220   : > { %v5911_v62 = vpop.f32.mrf.mxu1 }
 0x222   : > { %v5913_v2 = vpop.f32.mrf.mxu1 }
 0x224   : > { %v5915_v1 = vpop.f32.mrf.mxu1 }
 0x226   : > { %v5922_v35 = vpop.f32.mrf.mxu1 }
 0x228   : > { %v5932_v16 = vpop.f32.mrf.mxu1 }
 0x22a   : > { %v5938_v31 = vpop.f32.mrf.mxu1 }
 0x22c   : > { %v5940_v20 = vpop.f32.mrf.mxu1 }
 0x22e   : > { %v5956_v43 = vpop.f32.mrf.mxu1 }
 0x230   : > { %v5962_v36 = vpop.f32.mrf.mxu1 }
 0x232   : > { %v5978_v26 = vpop.f32.mrf.mxu1 }
 0x243   : > { %v2068_v3 = vpop.f32.mrf.mxu0 }
 0x244   : > { %v2069_v59 = vadd.f32 %v2068_v3, %v1956_v55 }
 0x245   : > { %v2070_v29 = vpop.f32.mrf.mxu0 }
 0x246   : > { %v2071_v10 = vadd.f32 %v2070_v29, %v1958_v6  ;;  %v2341_v56 = vmax.f32 %v2069_v59, 0.0  ;;  %v4574_v6 = vld [vmem:[%s6456_s5 + $0x1e8] ss:$12 sps:$4 sm:$0xff]   ;;  %v4578_v59 = vld [vmem:[%s6456_s5 + $0x1d0] ss:$12 sps:$4 sm:$0xff]  }
 0x247   : > { %v2072_v24 = vpop.f32.mrf.mxu0 }
 0x248   : > { %v2073_v12 = vadd.f32 %v2072_v24, %v1960_v45  ;;  %v2342_v19 = vmax.f32 %v2071_v10, 0.0  ;;  %v1982_v45 = vadd.f32 %v5907_v9, %v5926_v13 }
 0x249   : > { %v2074_v63 = vpop.f32.mrf.mxu0 }
 0x24a   : > { %v2075_v17 = vadd.f32 %v2074_v63, %v1962_v47  ;;  %v2344_v32 = vmax.f32 %v2073_v12, 0.0 }
 0x24b   : > { %v2078_v53 = vpop.f32.mrf.mxu0 }
 0x24c   : > { %v2345_v44 = vmax.f32 %v2075_v17, 0.0  ;;  %v5947_v54 = vpack.c.bf16 %v2344_v32, %v2341_v56  ;;  %v2079_v52 = vadd.f32 %v2078_v53, %v1966_v22  ;;  %v5984_v17 = vpop.f32.mrf.mxu1  ;;  %v4582_v22 = vld [vmem:[%s6456_s5 + $0x1b8] ss:$12 sps:$4 sm:$0xff]  }
 0x24d   : > { %v2080_v33 = vpop.f32.mrf.mxu0 }
 0x24e   : > { %v5944_v4 = vpack.c.bf16 %v2345_v44, %v2342_v19  ;;  %v2081_v60 = vadd.f32 %v2080_v33, %v1968_v37  ;;  %v2347_v23 = vmax.f32 %v2079_v52, 0.0  ;;  %v1988_v19 = vadd.f32 %v5911_v62, %v5926_v13  ;;  %v4584_v52 = vld [vmem:[%s6456_s5 + $0x1a0] ss:$12 sps:$4 sm:$0xff]  }
 0x24f   : > { %v2082_v58 = vpop.f32.mrf.mxu0  ;;  %v1990_v44 = vadd.f32 %v5913_v2, %v5930_v41  ;;  %v1986_v33 = vadd.f32 %v5909_v34, %v5930_v41  ;;  %v1992_v62 = vadd.f32 %v5915_v1, %v5926_v13  ;;  %v6002_v2 = vpop.f32.mrf.mxu1 }
 0x250   : > { %v2083_v25 = vadd.f32 %v2082_v58, %v1970_v61  ;;  %2972 = vmatprep.mubr.bf16.mxu0 %v5944_v4  ;;  %v2348_v18 = vmax.f32 %v2081_v60, 0.0 }
 0x251   : > { %v2084_v48 = vpop.f32.mrf.mxu0  ;;  %2973 = vmatmul.mubr.bf16.vlgmr.msra.gmra.mxu0 %v5947_v54 }
 0x252   : > { %v2085_v49 = vadd.f32 %v2084_v48, %v1972_v30  ;;  %4224 = vmatpush3.bf16.msra.mxu0 %v2938_v50  ;;  %v2350_v51 = vmax.f32 %v2083_v25, 0.0 }
 0x253   : > { %v2088_v57 = vpop.f32.mrf.mxu0  ;;  %4225 = vmatprep.subr.bf16.mxu0 %v4566_v7 }
 0x254   : > { %v2351_v40 = vmax.f32 %v2085_v49, 0.0  ;;  %v5970_v3 = vpack.c.bf16 %v2350_v51, %v2347_v23  ;;  %v2089_v24 = vadd.f32 %v2088_v57, %v1976_v14  ;;  %v2017_v49 = vpop.f32.mrf.mxu1  ;;  %v1996_v23 = vadd.f32 %v5922_v35, %v5930_v41 }
 0x255   : > { %v2090_v46 = vpop.f32.mrf.mxu0 }
 0x256   : > { %v5966_v5 = vpack.c.bf16 %v2351_v40, %v2348_v18  ;;  %4226 = vmatpush3.bf16.msra.mxu0 %v4566_v7  ;;  %v2091_v15 = vadd.f32 %v2090_v46, %v1978_v21  ;;  %v2353_v32 = vmax.f32 %v2089_v24, 0.0  ;;  %v2000_v18 = vadd.f32 %v5938_v31, %v5930_v41  ;;  %v2019_v31 = vpop.f32.mrf.mxu1 }
 0x257   : > { %v2092_v29 = vpop.f32.mrf.mxu0  ;;  %4227 = vmatprep.subr.bf16.mxu0 %v4570_v11 }
 0x258   : > { %v2093_v55 = vadd.f32 %v2092_v29, %v1980_v39  ;;  %2982 = vmatprep.mubr.bf16.mxu0 %v5966_v5  ;;  %v2354_v9 = vmax.f32 %v2091_v15, 0.0  ;;  %v4586_v39 = vld [vmem:[%s6456_s5 + $0x188] ss:$12 sps:$4 sm:$0xff]  }
 0x259   : > { %v2094_v47 = vpop.f32.mrf.mxu0  ;;  %2983 = vmatmul.mubr.bf16.gmra.mxu0 %v5970_v3 }
 0x25a   : > { %v2095_v42 = vadd.f32 %v2094_v47, %v1982_v45  ;;  %4228 = vmatpush3.bf16.msra.mxu0 %v4570_v11  ;;  %v2356_v10 = vmax.f32 %v2093_v55, 0.0  ;;  %v1998_v11 = vadd.f32 %v5932_v16, %v5926_v13  ;;  %v2002_v16 = vadd.f32 %v5940_v20, %v5926_v13 }
 0x25b   : > { %v2098_v12 = vpop.f32.mrf.mxu0  ;;  %4229 = vmatprep.subr.bf16.mxu0 %v4574_v6  ;;  %v2008_v20 = vadd.f32 %v5962_v36, %v5926_v13 }
 0x25c   : > { %v2357_v63 = vmax.f32 %v2095_v42, 0.0  ;;  %v5994_v37 = vpack.c.bf16 %v2356_v10, %v2353_v32  ;;  %v2099_v7 = vadd.f32 %v2098_v12, %v1986_v33  ;;  %v2021_v42 = vpop.f32.mrf.mxu1 }
 0x25d   : > { %v2100_v53 = vpop.f32.mrf.mxu0 }
 0x25e   : > { %v5990_v56 = vpack.c.bf16 %v2357_v63, %v2354_v9  ;;  %4230 = vmatpush3.bf16.msra.mxu0 %v4574_v6  ;;  %v2101_v58 = vadd.f32 %v2100_v53, %v1988_v19  ;;  %v2359_v51 = vmax.f32 %v2099_v7, 0.0  ;;  %v2006_v63 = vadd.f32 %v5956_v43, %v5930_v41  ;;  %v2025_v36 = vpop.f32.mrf.mxu1 }
 0x25f   : > { %v2102_v61 = vpop.f32.mrf.mxu0  ;;  %4231 = vmatprep.subr.bf16.mxu0 %v4578_v59  ;;  %v2012_v19 = vadd.f32 %v5984_v17, %v5926_v13  ;;  %v2020_v17 = vadd.f32 %v2019_v31, %v5930_v41 }
 0x260   : > { %v2103_v50 = vadd.f32 %v2102_v61, %v1990_v44  ;;  %2992 = vmatprep.mubr.bf16.mxu0 %v5990_v56  ;;  %v2360_v1 = vmax.f32 %v2101_v58, 0.0  ;;  %v2027_v7 = vpop.f32.mrf.mxu1 }
 0x261   : > { %v2104_v30 = vpop.f32.mrf.mxu0  ;;  %2993 = vmatmul.mubr.bf16.gmra.mxu0 %v5994_v37 }
 0x262   : > { %v2105_v34 = vadd.f32 %v2104_v30, %v1992_v62  ;;  %4232 = vmatpush3.bf16.msra.mxu0 %v4578_v59  ;;  %v2362_v60 = vmax.f32 %v2103_v50, 0.0  ;;  %v2010_v59 = vadd.f32 %v5978_v26, %v5930_v41 }
 0x263   : > { %v2108_v25 = vpop.f32.mrf.mxu0  ;;  %4233 = vmatprep.subr.bf16.mxu0 %v4582_v22 }
 0x264   : > { %v2363_v48 = vmax.f32 %v2105_v34, 0.0  ;;  %v6016_v46 = vpack.c.bf16 %v2362_v60, %v2359_v51  ;;  %v2109_v6 = vadd.f32 %v2108_v25, %v1996_v23  ;;  %v2018_v60 = vadd.f32 %v2017_v49, %v5926_v13 }
 0x265   : > { %v2110_v57 = vpop.f32.mrf.mxu0  ;;  %v2022_v51 = vadd.f32 %v2021_v42, %v5926_v13 }
 0x266   : > { %v6012_v40 = vpack.c.bf16 %v2363_v48, %v2360_v1  ;;  %4234 = vmatpush3.bf16.msra.mxu0 %v4582_v22  ;;  %v2111_v14 = vadd.f32 %v2110_v57, %v1998_v11  ;;  %v2365_v10 = vmax.f32 %v2109_v6, 0.0 }
 0x267   : > { %v2112_v21 = vpop.f32.mrf.mxu0  ;;  %4235 = vmatprep.subr.bf16.mxu0 %v4584_v52 }
 0x268   : > { %v2113_v29 = vadd.f32 %v2112_v21, %v2000_v18  ;;  %3002 = vmatprep.mubr.bf16.mxu0 %v6012_v40  ;;  %v2366_v24 = vmax.f32 %v2111_v14, 0.0  ;;  %v2029_v18 = vpop.f32.mrf.mxu1 }
 0x269   : > { %v2114_v45 = vpop.f32.mrf.mxu0  ;;  %3003 = vmatmul.mubr.bf16.gmra.mxu0 %v6016_v46 }
 0x26a   : > { %v2115_v35 = vadd.f32 %v2114_v45, %v2002_v16  ;;  %4236 = vmatpush3.bf16.msra.mxu0 %v4584_v52  ;;  %v2368_v15 = vmax.f32 %v2113_v29, 0.0  ;;  %v2016_v52 = vadd.f32 %v6002_v2, %v5930_v41  ;;  %v2031_v2 = vpop.f32.mrf.mxu1  ;;  %v2028_v45 = vadd.f32 %v2027_v7, %v5926_v13 }
 0x26b   : > { %v2118_v55 = vpop.f32.mrf.mxu0  ;;  %4237 = vmatprep.subr.bf16.mxu0 %v4586_v39  ;;  %v2032_v42 = vadd.f32 %v2031_v2, %v5926_v13  ;;  %v4587_v2 = vld [vmem:[%s6456_s5 + $0x158] ss:$12 sps:$4 sm:$0xff]  }
 0x26c   : > { %v2369_v47 = vmax.f32 %v2115_v35, 0.0  ;;  %v6033_v32 = vpack.c.bf16 %v2368_v15, %v2365_v10  ;;  %v2119_v61 = vadd.f32 %v2118_v55, %v2006_v63  ;;  %v2030_v35 = vadd.f32 %v2029_v18, %v5930_v41 }
 0x26d   : > { %v2120_v12 = vpop.f32.mrf.mxu0  ;;  %v2026_v55 = vadd.f32 %v2025_v36, %v5930_v41  ;;  %v6062_v41 = vrot.slane %v5920_v38, %v5614_v8 }
 0x26e   : > { %v6029_v9 = vpack.c.bf16 %v2369_v47, %v2366_v24  ;;  %4238 = vmatpush3.bf16.msra.mxu0 %v4586_v39  ;;  %v2121_v44 = vadd.f32 %v2120_v12, %v2008_v20  ;;  %v2371_v30 = vmax.f32 %v2119_v61, 0.0  ;;  %v4209_v20 = vpop.f32.mrf.mxu1 }
 0x26f   : > { %v2122_v53 = vpop.f32.mrf.mxu0 }
 0x270   : > { %v2123_v33 = vadd.f32 %v2122_v53, %v2010_v59  ;;  %3012 = vmatprep.mubr.bf16.mxu0 %v6029_v9  ;;  %v2372_v50 = vmax.f32 %v2121_v44, 0.0  ;;  %v2278_v36 = vpop.f32.mrf.mxu1 }
 0x271   : > { %v2124_v22 = vpop.f32.mrf.mxu0  ;;  %3013 = vmatmul.mubr.bf16.gmra.mxu0 %v6033_v32 }
 0x272   : > { %v2125_v26 = vadd.f32 %v2124_v22, %v2012_v19  ;;  %v2374_v62 = vmax.f32 %v2123_v33, 0.0  ;;  %v4210_v7 = vpop.f32.mrf.mxu1 }
 0x273   : > { %v2128_v58 = vpop.f32.mrf.mxu0 }
 0x274   : > { %v2375_v43 = vmax.f32 %v2125_v26, 0.0  ;;  %v6045_v1 = vpack.c.bf16 %v2374_v62, %v2371_v30  ;;  %v2129_v23 = vadd.f32 %v2128_v58, %v2016_v52  ;;  %v2281_v52 = vpop.f32.mrf.mxu1 }
 0x275   : > { %v2130_v34 = vpop.f32.mrf.mxu0 }
 0x276   : > { %v6041_v25 = vpack.c.bf16 %v2375_v43, %v2372_v50  ;;  %v2131_v57 = vadd.f32 %v2130_v34, %v2018_v60  ;;  %v2377_v31 = vmax.f32 %v2129_v23, 0.0 }
 0x277   : > { %v2132_v48 = vpop.f32.mrf.mxu0 }
 0x278   : > { %v2133_v11 = vadd.f32 %v2132_v48, %v2020_v17  ;;  %3022 = vmatprep.mubr.bf16.mxu0 %v6041_v25  ;;  %v2378_v14 = vmax.f32 %v2131_v57, 0.0 }
 0x279   : > { %v2134_v21 = vpop.f32.mrf.mxu0  ;;  %3023 = vmatmul.mubr.bf16.gmra.mxu0 %v6045_v1 }
 0x27a   : > { %v2135_v49 = vadd.f32 %v2134_v21, %v2022_v51  ;;  %v2380_v39 = vmax.f32 %v2133_v11, 0.0 }
 0x27b   : > { %v2138_v16 = vpop.f32.mrf.mxu0 }
 0x27c   : > { %v2381_v29 = vmax.f32 %v2135_v49, 0.0  ;;  %v6055_v24 = vpack.c.bf16 %v2380_v39, %v2377_v31  ;;  %v2139_v59 = vadd.f32 %v2138_v16, %v2026_v55  ;;  %v4213_v49 = vpop.f32.mrf.mxu1  ;;  %v4585_v16 = vld [vmem:[%s6456_s5 + $0xb0] ss:$12 sps:$4 sm:$0xff]  }
 0x27d   : > { %v2140_v6 = vpop.f32.mrf.mxu0 }
 0x27e   : > { %v6052_v15 = vpack.c.bf16 %v2381_v29, %v2378_v14  ;;  %v2141_v10 = vadd.f32 %v2140_v6, %v2028_v45  ;;  %v2383_v13 = vmax.f32 %v2139_v59, 0.0 }
 0x27f   : > { %v2142_v47 = vpop.f32.mrf.mxu0 }
 0x280   : > { %v2143_v12 = vadd.f32 %v2142_v47, %v2030_v35  ;;  %3032 = vmatprep.mubr.bf16.mxu0 %v6052_v15  ;;  %v2384_v33 = vmax.f32 %v2141_v10, 0.0  ;;  %v2294_v35 = vpop.f32.mrf.mxu1  ;;  %v4588_v47 = vld [vmem:[%s6456_s5 + $0x98] ss:$12 sps:$4 sm:$0xff]  }
 0x281   : > { %v2144_v63 = vpop.f32.mrf.mxu0  ;;  %3033 = vmatmul.mubr.bf16.gmra.mxu0 %v6055_v24 }
 0x282   : > { %v2145_v53 = vadd.f32 %v2144_v63, %v2032_v42  ;;  %v2386_v19 = vmax.f32 %v2143_v12, 0.0  ;;  %v4589_v12 = vld [vmem:[%s6456_s5 + $0x140] ss:$12 sps:$4 sm:$0xff]  }
 0x283   : > { %v4015_v44 = vpop.f32.mrf.mxu0 }
 0x284   : > { %v2387_v61 = vmax.f32 %v2145_v53, 0.0  ;;  %v6066_v58 = vpack.c.bf16 %v2386_v19, %v2383_v13  ;;  %v4214_v19 = vpop.f32.mrf.mxu1  ;;  %v4591_v13 = vld [vmem:[%s6456_s5 + $0x128] ss:$12 sps:$4 sm:$0xff]  }
 0x285   : > { %v4016_v22 = vpop.f32.mrf.mxu0 }
 0x286   : > { %v6064_v26 = vpack.c.bf16 %v2387_v61, %v2384_v33  ;;  %v4017_v62 = vadd.f32 %v4016_v22, %v4015_v44  ;;  %v4590_v33 = vld [vmem:[%s6456_s5 + $0x80] ss:$12 sps:$4 sm:$0xff]  }
 0x287   : > { %v4018_v50 = vpop.f32.mrf.mxu0 }
 0x288   : > { %v2182_v43 = vadd.f32 %v4017_v62, %v6062_v41  ;;  %3042 = vmatprep.mubr.bf16.mxu0 %v6064_v26 }
 0x289   : > { %v4019_v30 = vpop.f32.mrf.mxu0  ;;  %3043 = vmatmul.mubr.bf16.gmra.mxu0 %v6066_v58 }
 0x28a   : > { %v4020_v34 = vadd.f32 %v4019_v30, %v4018_v50  ;;  %v2279_v60 = vadd.f32 %v2278_v36, %v2182_v43  ;;  %v2297_v43 = vpop.f32.mrf.mxu1  ;;  %v4592_v30 = vld [vmem:[%s6456_s5 + $0x68] ss:$12 sps:$4 sm:$0xff]  }
 0x28b   : > { %v4021_v38 = vpop.f32.mrf.mxu0 }
 0x28c   : > { %v2185_v17 = vadd.f32 %v4020_v34, %v6062_v41  ;;  %v2343_v18 = vmax.f32 %v2279_v60, 0.0  ;;  %v4593_v60 = vld [vmem:[%s6456_s5 + $0x110] ss:$12 sps:$4 sm:$0xff]  }
 0x28d   : > { %v4022_v48 = vpop.f32.mrf.mxu0 }
 0x28e   : > { %v2282_v51 = vadd.f32 %v2281_v52, %v2185_v17  ;;  %v4023_v57 = vadd.f32 %v4022_v48, %v4021_v38 }
 0x28f   : > { %v4024_v11 = vpop.f32.mrf.mxu0 }
 0x290   : > { %v2346_v23 = vmax.f32 %v2282_v51, 0.0  ;;  %v2190_v21 = vadd.f32 %v4023_v57, %v6062_v41  ;;  %v4217_v57 = vpop.f32.mrf.mxu1 }
 0x291   : > { %v4025_v39 = vpop.f32.mrf.mxu0 }
 0x292   : > { %v2391_v14 = vpack.c.bf16 %v2346_v23, %v2343_v18  ;;  %v4026_v29 = vadd.f32 %v4025_v39, %v4024_v11  ;;  %v2287_v6 = vadd.f32 %v4209_v20, %v2190_v21  ;;  %v4594_v18 = vld [vmem:[%s6456_s5 + $0x50] ss:$12 sps:$4 sm:$0xff]   ;;  %v4595_v39 = vld [vmem:[%s6456_s5 + $0xf8] ss:$12 sps:$4 sm:$0xff]  }
 0x293   : > { %v4027_v31 = vpop.f32.mrf.mxu0 }
 0x294   : > { %v2193_v45 = vadd.f32 %v4026_v29, %v6062_v41  ;;  %3898 = vmatmul.mubr.msk.bf16.vlgmr.msra.gmra.mxu1 %vm867_vm1, %v2391_v14  ;;  %4239 = vmatprep.mubr.msk.bf16.mxu0 %vm867_vm1, %v2391_v14  ;;  %v2349_v59 = vmax.f32 %v2287_v6, 0.0  ;;  %v4596_v6 = vld [vmem:[%s6456_s5 + $0x38] ss:$12 sps:$4 sm:$0xff]  }
 0x295   : > { %v4028_v55 = vpop.f32.mrf.mxu0  ;;  %4080 = vmatpush3.bf16.msra.mxu1 %v4585_v16  ;;  %3095 = vmatprep.mubr.bf16.mxu1 %v4746_v0 }
 0x296   : > { %v2290_v42 = vadd.f32 %v4210_v7, %v2193_v45  ;;  %v4029_v10 = vadd.f32 %v4028_v55, %v4027_v31  ;;  %4081 = vmatprep.subr.bf16.mxu1 %v4587_v2  ;;  %v2310_v2 = vpop.f32.mrf.mxu1 }
 0x297   : > { %v4030_v20 = vpop.f32.mrf.mxu0 }
 0x298   : > { %v2352_v63 = vmax.f32 %v2290_v42, 0.0  ;;  %v2198_v53 = vadd.f32 %v4029_v10, %v6062_v41 }
 0x299   : > { %v4031_v44 = vpop.f32.mrf.mxu0  ;;  %4082 = vmatpush3.bf16.msra.mxu1 %v4588_v47 }
 0x29a   : > { %v2394_v61 = vpack.c.bf16 %v2352_v63, %v2349_v59  ;;  %v4032_v36 = vadd.f32 %v4031_v44, %v4030_v20  ;;  %4083 = vmatprep.subr.bf16.mxu1 %v4589_v12  ;;  %v2295_v62 = vadd.f32 %v2294_v35, %v2198_v53  ;;  %v4218_v12 = vpop.f32.mrf.mxu1  ;;  %v4598_v59 = vld [vmem:[%s6456_s5 + $0x20] ss:$12 sps:$4 sm:$0xff]  }
 0x29b   : > { %v4033_v22 = vpop.f32.mrf.mxu0 }
 0x29c   : > { %v2201_v50 = vadd.f32 %v4032_v36, %v6062_v41  ;;  %3899 = vmatmul.mubr.msk.bf16.gmra.mxu1 %vm867_vm1, %v2394_v61  ;;  %4240 = vmatmul.mubr.msk.bf16.vlgmr.msra.gmra.mxu0 %vm867_vm1, %v2394_v61  ;;  %v2355_v52 = vmax.f32 %v2295_v62, 0.0  ;;  %v2313_v36 = vpop.f32.mrf.mxu1 }
 0x29d   : > { %v4034_v7 = vpop.f32.mrf.mxu0  ;;  %3105 = vmatprep.mubr.bf16.mxu1 %v4746_v0  ;;  %4084 = vmatpush3.bf16.msra.mxu1 %v4590_v33 }
 0x29e   : > { %v2298_v34 = vadd.f32 %v2297_v43, %v2201_v50  ;;  %v4035_v38 = vadd.f32 %v4034_v7, %v4033_v22  ;;  %4085 = vmatprep.subr.bf16.mxu1 %v4591_v13  ;;  %v4600_v22 = vld [vmem:[%s6456_s5 + $0x8] ss:$12 sps:$4 sm:$0xff]  }
 0x29f   : > { %v4036_v17 = vpop.f32.mrf.mxu0 }
 0x2a0   : > { %v2358_v48 = vmax.f32 %v2298_v34, 0.0  ;;  %v2206_v51 = vadd.f32 %v4035_v38, %v6062_v41  ;;  %v4221_v38 = vpop.f32.mrf.mxu1 }
 0x2a1   : > { %v4037_v11 = vpop.f32.mrf.mxu0  ;;  %4086 = vmatpush3.bf16.msra.mxu1 %v4592_v30 }
 0x2a2   : > { %v2397_v23 = vpack.c.bf16 %v2358_v48, %v2355_v52  ;;  %v4038_v21 = vadd.f32 %v4037_v11, %v4036_v17  ;;  %4087 = vmatprep.subr.bf16.mxu1 %v4593_v60  ;;  %v2303_v14 = vadd.f32 %v4213_v49, %v2206_v51  ;;  %v4597_v49 = vld [vmem:[%s6456_s5 + $0xe0] ss:$12 sps:$4 sm:$0xff]  }
 0x2a3   : > { %v4039_v16 = vpop.f32.mrf.mxu0 }
 0x2a4   : > { %v2209_v29 = vadd.f32 %v4038_v21, %v6062_v41  ;;  %3900 = vmatmul.mubr.msk.bf16.gmra.mxu1 %vm867_vm1, %v2397_v23  ;;  %4243 = vmatprep.mubr.msk.bf16.mxu0 %vm867_vm1, %v2397_v23  ;;  %v2361_v47 = vmax.f32 %v2303_v14, 0.0 }
 0x2a5   : > { %v4040_v31 = vpop.f32.mrf.mxu0  ;;  %3115 = vmatprep.mubr.bf16.mxu1 %v4746_v0  ;;  %4088 = vmatpush3.bf16.msra.mxu1 %v4594_v18  ;;  %v2326_v18 = vpop.f32.mrf.mxu1 }
 0x2a6   : > { %v2306_v45 = vadd.f32 %v4214_v19, %v2209_v29  ;;  %v4041_v35 = vadd.f32 %v4040_v31, %v4039_v16  ;;  %4089 = vmatprep.subr.bf16.mxu1 %v4595_v39  ;;  %v4599_v19 = vld [vmem:[%s6456_s5 + $0xc8] ss:$12 sps:$4 sm:$0xff]  }
 0x2a7   : > { %v4042_v55 = vpop.f32.mrf.mxu0  ;;  %v4222_v31 = vpop.f32.mrf.mxu1 }
 0x2a8   : > { %v2364_v42 = vmax.f32 %v2306_v45, 0.0  ;;  %v2214_v10 = vadd.f32 %v4041_v35, %v6062_v41 }
 0x2a9   : > { %v4043_v20 = vpop.f32.mrf.mxu0  ;;  %4090 = vmatpush3.bf16.msra.mxu1 %v4596_v6 }
 0x2aa   : > { %v2400_v63 = vpack.c.bf16 %v2364_v42, %v2361_v47  ;;  %v4044_v53 = vadd.f32 %v4043_v20, %v4042_v55  ;;  %4091 = vmatprep.subr.bf16.mxu1 %v4597_v49  ;;  %v2311_v33 = vadd.f32 %v2310_v2, %v2214_v10  ;;  %v2329_v47 = vpop.f32.mrf.mxu1 }
 0x2ab   : > { %v4045_v44 = vpop.f32.mrf.mxu0 }
 0x2ac   : > { %v2217_v61 = vadd.f32 %v4044_v53, %v6062_v41  ;;  %3901 = vmatmul.mubr.msk.bf16.gmra.mxu1 %vm867_vm1, %v2400_v63  ;;  %4244 = vmatmul.mubr.msk.bf16.gmra.mxu0 %vm867_vm1, %v2400_v63  ;;  %v2367_v7 = vmax.f32 %v2311_v33, 0.0 }
 0x2ad   : > { %v4046_v13 = vpop.f32.mrf.mxu0  ;;  %3125 = vmatprep.mubr.bf16.mxu1 %v4746_v0  ;;  %4092 = vmatpush3.bf16.msra.mxu1 %v4598_v59 }
 0x2ae   : > { %v2314_v62 = vadd.f32 %v2313_v36, %v2217_v61  ;;  %v4047_v50 = vadd.f32 %v4046_v13, %v4045_v44  ;;  %4093 = vmatprep.subr.bf16.mxu1 %v4599_v19 }
 0x2af   : > { %v4048_v43 = vpop.f32.mrf.mxu0 }
 0x2b0   : > { %v2370_v30 = vmax.f32 %v2314_v62, 0.0  ;;  %v2222_v34 = vadd.f32 %v4047_v50, %v6062_v41 }
 0x2b1   : > { %v4049_v60 = vpop.f32.mrf.mxu0  ;;  %4094 = vmatpush3.bf16.msra.mxu1 %v4600_v22 }
 0x2b2   : > { %v2403_v17 = vpack.c.bf16 %v2370_v30, %v2367_v7  ;;  %v4050_v52 = vadd.f32 %v4049_v60, %v4048_v43  ;;  %v2319_v51 = vadd.f32 %v4217_v57, %v2222_v34 }
 0x2b3   : > { %v4051_v48 = vpop.f32.mrf.mxu0 }
 0x2b4   : > { %v2225_v11 = vadd.f32 %v4050_v52, %v6062_v41  ;;  %3902 = vmatmul.mubr.msk.bf16.gmra.mxu1 %vm867_vm1, %v2403_v17  ;;  %4247 = vmatprep.mubr.msk.bf16.mxu0 %vm867_vm1, %v2403_v17  ;;  %v2373_v14 = vmax.f32 %v2319_v51, 0.0 }
 0x2b5   : > { %v4052_v23 = vpop.f32.mrf.mxu0  ;;  %3135 = vmatprep.mubr.bf16.mxu1 %v4746_v0 }
 0x2b6   : > { %v2322_v21 = vadd.f32 %v4218_v12, %v2225_v11  ;;  %v4053_v39 = vadd.f32 %v4052_v23, %v4051_v48  ;;  %v4601_v23 = vld [vmem:[%s4886_s14] sm:$0xff] }
 0x2b7   : > { %v4054_v16 = vpop.f32.mrf.mxu0 }
 0x2b8   : > { %v2376_v29 = vmax.f32 %v2322_v21, 0.0  ;;  %v2230_v2 = vadd.f32 %v4053_v39, %v6062_v41 }
 0x2b9   : > { %v4055_v6 = vpop.f32.mrf.mxu0 }
 0x2ba   : > { %v2406_v57 = vpack.c.bf16 %v2376_v29, %v2373_v14  ;;  %v4056_v45 = vadd.f32 %v4055_v6, %v4054_v16  ;;  %v2327_v49 = vadd.f32 %v2326_v18, %v2230_v2 }
 0x2bb   : > { %v4057_v35 = vpop.f32.mrf.mxu0 }
 0x2bc   : > { %v2233_v55 = vadd.f32 %v4056_v45, %v6062_v41  ;;  %3903 = vmatmul.mubr.msk.bf16.gmra.mxu1 %vm867_vm1, %v2406_v57  ;;  %4248 = vmatmul.mubr.msk.bf16.gmra.mxu0 %vm867_vm1, %v2406_v57  ;;  %v2379_v59 = vmax.f32 %v2327_v49, 0.0 }
 0x2bd   : > { %v4058_v42 = vpop.f32.mrf.mxu0  ;;  %3145 = vmatprep.mubr.bf16.mxu1 %v4746_v0 }
 0x2be   : > { %v2330_v10 = vadd.f32 %v2329_v47, %v2233_v55  ;;  %v4059_v12 = vadd.f32 %v4058_v42, %v4057_v35  ;;  %v4603_v42 = vld [vmem:[%s4886_s14 + $0x18] sm:$0xff] }
 0x2bf   : > { %v4060_v20 = vpop.f32.mrf.mxu0 }
 0x2c0   : > { %v2382_v63 = vmax.f32 %v2330_v10, 0.0  ;;  %v2238_v53 = vadd.f32 %v4059_v12, %v6062_v41 }
 0x2c1   : > { %v4061_v19 = vpop.f32.mrf.mxu0 }
 0x2c2   : > { %v2409_v44 = vpack.c.bf16 %v2382_v63, %v2379_v59  ;;  %v4062_v33 = vadd.f32 %v4061_v19, %v4060_v20  ;;  %v2335_v61 = vadd.f32 %v4221_v38, %v2238_v53  ;;  %v4604_v19 = vld [vmem:[%s4886_s14 + $0x20] sm:$0xff] }
 0x2c4   : > { %v2241_v36 = vadd.f32 %v4062_v33, %v6062_v41  ;;  %3904 = vmatmul.mubr.msk.bf16.gmra.mxu1 %vm867_vm1, %v2409_v44  ;;  %4251 = vmatprep.mubr.msk.bf16.mxu0 %vm867_vm1, %v2409_v44  ;;  %v2385_v22 = vmax.f32 %v2335_v61, 0.0  ;;  %v6185_v41 = vld [vmem:[%s6457_s6] sm:$0x7] }
 0x2c5   : > { %3155 = vmatprep.mubr.bf16.mxu1 %v4746_v0  ;;  %v6195_v43 = vrot.slane %v6185_v41, %v5440_v27 }
 0x2c6   : > { %v2338_v13 = vadd.f32 %v4222_v31, %v2241_v36  ;;  %v4602_v31 = vld [vmem:[%s4886_s14 + $0x8] sm:$0xff] }
 0x2c8   : > { %v2388_v62 = vmax.f32 %v2338_v13, 0.0 }
 0x2ca   : > { %v2412_v50 = vpack.c.bf16 %v2388_v62, %v2385_v22 }
 0x2cc   : > { %3905 = vmatmul.mubr.msk.bf16.gmra.mxu1 %vm867_vm1, %v2412_v50  ;;  %4252 = vmatmul.mubr.msk.bf16.gmra.mxu0 %vm867_vm1, %v2412_v50  ;;  %v4605_v50 = vld [vmem:[%s4886_s14 + $0x30] sm:$0xff] }
 0x2cd   : > { %3198 = vmatprep.mubr.bf16.mxu1 %v5944_v4 }
 0x2d4   : > { %3199 = vmatmul.mubr.bf16.vlgmr.msra.gmra.mxu1 %v5947_v54 }
 0x2d5   : > { %3206 = vmatprep.mubr.bf16.mxu1 %v5966_v5 }
 0x2dc   : > { %3207 = vmatmul.mubr.bf16.gmra.mxu1 %v5970_v3 }
 0x2dd   : > { %3214 = vmatprep.mubr.bf16.mxu1 %v5990_v56 }
 0x2e4   : > { %3215 = vmatmul.mubr.bf16.gmra.mxu1 %v5994_v37 }
 0x2e5   : > { %3222 = vmatprep.mubr.bf16.mxu1 %v6012_v40 }
 0x2ec   : > { %3223 = vmatmul.mubr.bf16.gmra.mxu1 %v6016_v46 }
 0x2ed   : > { %3230 = vmatprep.mubr.bf16.mxu1 %v6029_v9 }
 0x2f4   : > { %3231 = vmatmul.mubr.bf16.gmra.mxu1 %v6033_v32 }
 0x2f5   : > { %3238 = vmatprep.mubr.bf16.mxu1 %v6041_v25 }
 0x2fc   : > { %3239 = vmatmul.mubr.bf16.gmra.mxu1 %v6045_v1 }
 0x2fd   : > { %3246 = vmatprep.mubr.bf16.mxu1 %v6052_v15 }
 0x304   : > { %3247 = vmatmul.mubr.bf16.gmra.mxu1 %v6055_v24 }
 0x305   : > { %3254 = vmatprep.mubr.bf16.mxu1 %v6064_v26 }
 0x30c   : > { %3255 = vmatmul.mubr.bf16.gmra.mxu1 %v6066_v58  ;;  %v6191_v58 = vrot.slane %v6185_v41, %v5443_v28 }
 0x311   : > { %v2974_v0 = vpop.f32.mrf.mxu0 }
 0x312   : > { %v2975_v30 = vadd.f32 %v2974_v0, %v6191_v58 }
 0x313   : > { %v2976_v4 = vpop.f32.mrf.mxu0 }
 0x314   : > { %v2977_v38 = vadd.f32 %v2976_v4, %v6195_v43 }
 0x315   : > { %v2978_v54 = vpop.f32.mrf.mxu0 }
 0x316   : > { %v2979_v48 = vadd.f32 %v2978_v54, %v6191_v58 }
 0x317   : > { %v2980_v5 = vpop.f32.mrf.mxu0 }
 0x318   : > { %v2981_v27 = vadd.f32 %v2980_v5, %v6195_v43 }
 0x319   : > { %v2984_v3 = vpop.f32.mrf.mxu0 }
 0x31a   : > { %v2985_v14 = vadd.f32 %v2984_v3, %v6191_v58 }
 0x31b   : > { %v2986_v56 = vpop.f32.mrf.mxu0 }
 0x31c   : > { %v2987_v35 = vadd.f32 %v2986_v56, %v6195_v43 }
 0x31d   : > { %v2988_v37 = vpop.f32.mrf.mxu0 }
 0x31e   : > { %v2989_v59 = vadd.f32 %v2988_v37, %v6191_v58  ;;  %v4606_v37 = vld [vmem:[%s4886_s14 + $0x38] sm:$0xff] }
 0x31f   : > { %v2990_v40 = vpop.f32.mrf.mxu0 }
 0x320   : > { %v2991_v36 = vadd.f32 %v2990_v40, %v6195_v43 }
 0x321   : > { %v2994_v46 = vpop.f32.mrf.mxu0 }
 0x322   : > { %v2995_v5 = vadd.f32 %v2994_v46, %v6191_v58 }
 0x323   : > { %v6170_v9 = vpop.f32.mrf.mxu0 }
 0x325   : > { %v6172_v32 = vpop.f32.mrf.mxu0 }
 0x327   : > { %v6174_v25 = vpop.f32.mrf.mxu0 }
 0x329   : > { %v6176_v1 = vpop.f32.mrf.mxu0 }
 0x32b   : > { %v6178_v15 = vpop.f32.mrf.mxu0 }
 0x32d   : > { %v6180_v24 = vpop.f32.mrf.mxu0 }
 0x32f   : > { %v6187_v26 = vpop.f32.mrf.mxu0 }
 0x331   : > { %v6197_v7 = vpop.f32.mrf.mxu0 }
 0x333   : > { %v6201_v60 = vpop.f32.mrf.mxu0 }
 0x335   : > { %v6205_v18 = vpop.f32.mrf.mxu0 }
 0x337   : > { %v6211_v55 = vpop.f32.mrf.mxu0 }
 0x339   : > { %v6223_v22 = vpop.f32.mrf.mxu0 }
 0x354   : > { %v3087_v34 = vpop.f32.mrf.mxu1 }
 0x355   : > { %v3088_v17 = vadd.f32 %v3087_v34, %v2975_v30 }
 0x356   : > { %v3089_v52 = vpop.f32.mrf.mxu1 }
 0x357   : > { %v3360_v28 = vmax.f32 %v3088_v17, 0.0  ;;  %v3090_v51 = vadd.f32 %v3089_v52, %v2977_v38  ;;  %v2997_v38 = vadd.f32 %v6170_v9, %v6195_v43  ;;  %v6232_v52 = vpop.f32.mrf.mxu0 }
 0x358   : > { %v3091_v11 = vpop.f32.mrf.mxu1 }
 0x359   : > { %v3408_v21 = vadd.f32 %v4601_v23, %v3360_v28  ;;  %v3361_v39 = vmax.f32 %v3090_v51, 0.0  ;;  %v3092_v16 = vadd.f32 %v3091_v11, %v2979_v48  ;;  %v4607_v28 = vld [vmem:[%s4886_s14 + $0x48] sm:$0xff] }
 0x35a   : > { %v3093_v29 = vpop.f32.mrf.mxu1 }
 0x35b   : > { %v3456_v2 = vmax.f32 %v3408_v21, 0.0  ;;  %v3409_v6 = vadd.f32 %v4602_v31, %v3361_v39  ;;  %v3363_v57 = vmax.f32 %v3092_v16, 0.0  ;;  %v3094_v45 = vadd.f32 %v3093_v29, %v2981_v27  ;;  %v4608_v39 = vld [vmem:[%s4886_s14 + $0x50] sm:$0xff]  ;;  %v6242_v31 = vpop.f32.mrf.mxu0 }
 0x35c   : > { %v3097_v49 = vpop.f32.mrf.mxu1  ;;  %v2999_v27 = vadd.f32 %v6172_v32, %v6191_v58  ;;  %v3001_v29 = vadd.f32 %v6174_v25, %v6195_v43 }
 0x35d   : > { %3504 = vst [vmem:[%s6215_s9] sm:$0xff] %v3456_v2  ;;  %v3457_v47 = vmax.f32 %v3409_v6, 0.0  ;;  %v3411_v10 = vadd.f32 %v4603_v42, %v3363_v57  ;;  %v3364_v12 = vmax.f32 %v3094_v45, 0.0  ;;  %v3098_v20 = vadd.f32 %v3097_v49, %v2985_v14  ;;  %v4609_v57 = vld [vmem:[%s4886_s14 + $0x60] sm:$0xff] }
 0x35e   : > { %v3099_v63 = vpop.f32.mrf.mxu1  ;;  %v3005_v49 = vadd.f32 %v6176_v1, %v6191_v58 }
 0x35f   : > { %3505 = vst [vmem:[%s6215_s9 + $0x8] sm:$0xff] %v3457_v47  ;;  %v3459_v53 = vmax.f32 %v3411_v10, 0.0  ;;  %v3412_v44 = vadd.f32 %v4604_v19, %v3364_v12  ;;  %v3366_v33 = vmax.f32 %v3098_v20, 0.0  ;;  %v3100_v61 = vadd.f32 %v3099_v63, %v2987_v35  ;;  %v4610_v10 = vld [vmem:[%s4886_s14 + $0x68] sm:$0xff] }
 0x360   : > { %v3101_v13 = vpop.f32.mrf.mxu1 }
 0x361   : > { %3507 = vst [vmem:[%s6215_s9 + $0x18] sm:$0xff] %v3459_v53  ;;  %v3460_v62 = vmax.f32 %v3412_v44, 0.0  ;;  %v3414_v0 = vadd.f32 %v4605_v50, %v3366_v33  ;;  %v3367_v4 = vmax.f32 %v3100_v61, 0.0  ;;  %v3102_v54 = vadd.f32 %v3101_v13, %v2989_v59  ;;  %v6252_v53 = vpop.f32.mrf.mxu0  ;;  %v4611_v44 = vld [vmem:[%s4886_s14 + $0x78] sm:$0xff]  ;;  %v4612_v50 = vld [vmem:[%s4886_s14 + $0x80] sm:$0xff] }
 0x362   : > { %v3103_v3 = vpop.f32.mrf.mxu1  ;;  %v3007_v59 = vadd.f32 %v6178_v15, %v6195_v43 }
 0x363   : > { %3508 = vst [vmem:[%s6215_s9 + $0x20] sm:$0xff] %v3460_v62  ;;  %v3462_v56 = vmax.f32 %v3414_v0, 0.0  ;;  %v3415_v30 = vadd.f32 %v4606_v37, %v3367_v4  ;;  %v3369_v40 = vmax.f32 %v3102_v54, 0.0  ;;  %v3104_v34 = vadd.f32 %v3103_v3, %v2991_v36  ;;  %v6262_v3 = vpop.f32.mrf.mxu0  ;;  %v4613_v37 = vld [vmem:[%s4886_s14 + $0x90] sm:$0xff] }
 0x364   : > { %v3107_v17 = vpop.f32.mrf.mxu1  ;;  %v3009_v36 = vadd.f32 %v6180_v24, %v6191_v58  ;;  %v3011_v54 = vadd.f32 %v6187_v26, %v6195_v43 }
 0x365   : > { %3510 = vst [vmem:[%s6215_s9 + $0x30] sm:$0xff] %v3462_v56  ;;  %v3463_v48 = vmax.f32 %v3415_v30, 0.0  ;;  %v3417_v46 = vadd.f32 %v4607_v28, %v3369_v40  ;;  %v3370_v51 = vmax.f32 %v3104_v34, 0.0  ;;  %v3108_v11 = vadd.f32 %v3107_v17, %v2995_v5 }
 0x366   : > { %v3109_v23 = vpop.f32.mrf.mxu1  ;;  %v3015_v34 = vadd.f32 %v6197_v7, %v6191_v58 }
 0x367   : > { %3511 = vst [vmem:[%s6215_s9 + $0x38] sm:$0xff] %v3463_v48  ;;  %v3465_v21 = vmax.f32 %v3417_v46, 0.0  ;;  %v3418_v9 = vadd.f32 %v4608_v39, %v3370_v51  ;;  %v3372_v16 = vmax.f32 %v3108_v11, 0.0  ;;  %v3110_v14 = vadd.f32 %v3109_v23, %v2997_v38  ;;  %v4614_v48 = vld [vmem:[%s4886_s14 + $0x98] sm:$0xff] }
 0x368   : > { %v3111_v2 = vpop.f32.mrf.mxu1  ;;  %v3017_v51 = vadd.f32 %v6201_v60, %v6195_v43 }
 0x369   : > { %3513 = vst [vmem:[%s6215_s9 + $0x48] sm:$0xff] %v3465_v21  ;;  %v3466_v6 = vmax.f32 %v3418_v9, 0.0  ;;  %v3420_v32 = vadd.f32 %v4609_v57, %v3372_v16  ;;  %v3373_v45 = vmax.f32 %v3110_v14, 0.0  ;;  %v3112_v35 = vadd.f32 %v3111_v2, %v2999_v27  ;;  %v6272_v27 = vpop.f32.mrf.mxu0  ;;  %v4615_v21 = vld [vmem:[%s4886_s14 + $0xa8] sm:$0xff]  ;;  %v4616_v2 = vld [vmem:[%s4886_s14 + $0xb0] sm:$0xff] }
 0x36a   : > { %v3113_v47 = vpop.f32.mrf.mxu1  ;;  %v3019_v16 = vadd.f32 %v6205_v18, %v6191_v58 }
 0x36b   : > { %3514 = vst [vmem:[%s6215_s9 + $0x50] sm:$0xff] %v3466_v6  ;;  %v3468_v42 = vmax.f32 %v3420_v32, 0.0  ;;  %v3421_v25 = vadd.f32 %v4610_v10, %v3373_v45  ;;  %v3375_v12 = vmax.f32 %v3112_v35, 0.0  ;;  %v3114_v20 = vadd.f32 %v3113_v47, %v3001_v29  ;;  %v3038_v35 = vpop.f32.mrf.mxu0  ;;  %v4617_v47 = vld [vmem:[%s4886_s14 + $0xc0] sm:$0xff] }
 0x36c   : > { %v3117_v63 = vpop.f32.mrf.mxu1  ;;  %v3021_v32 = vadd.f32 %v6211_v55, %v6195_v43 }
 0x36d   : > { %3516 = vst [vmem:[%s6215_s9 + $0x60] sm:$0xff] %v3468_v42  ;;  %v3469_v19 = vmax.f32 %v3421_v25, 0.0  ;;  %v3423_v1 = vadd.f32 %v4611_v44, %v3375_v12  ;;  %v3376_v33 = vmax.f32 %v3114_v20, 0.0  ;;  %v3118_v61 = vadd.f32 %v3117_v63, %v3005_v49 }
 0x36e   : > { %v3119_v13 = vpop.f32.mrf.mxu1  ;;  %v3025_v25 = vadd.f32 %v6223_v22, %v6191_v58  ;;  %v3027_v44 = vadd.f32 %v6232_v52, %v6195_v43 }
 0x36f   : > { %3517 = vst [vmem:[%s6215_s9 + $0x68] sm:$0xff] %v3469_v19  ;;  %v3471_v62 = vmax.f32 %v3423_v1, 0.0  ;;  %v3424_v15 = vadd.f32 %v4612_v50, %v3376_v33  ;;  %v3378_v0 = vmax.f32 %v3118_v61, 0.0  ;;  %v3120_v4 = vadd.f32 %v3119_v13, %v3007_v59  ;;  %v4618_v59 = vld [vmem:[%s4886_s14 + $0xc8] sm:$0xff]  ;;  %v3040_v33 = vpop.f32.mrf.mxu0 }
 0x370   : > { %v3121_v5 = vpop.f32.mrf.mxu1  ;;  %v3029_v50 = vadd.f32 %v6242_v31, %v6191_v58 }
 0x371   : > { %3519 = vst [vmem:[%s6215_s9 + $0x78] sm:$0xff] %v3471_v62  ;;  %v3472_v56 = vmax.f32 %v3424_v15, 0.0  ;;  %v3426_v24 = vadd.f32 %v4613_v37, %v3378_v0  ;;  %v3379_v30 = vmax.f32 %v3120_v4, 0.0  ;;  %v3122_v40 = vadd.f32 %v3121_v5, %v3009_v36  ;;  %v4619_v36 = vld [vmem:[%s4886_s14 + $0xd8] sm:$0xff]  ;;  %v4620_v4 = vld [vmem:[%s4886_s14 + $0xe0] sm:$0xff] }
 0x372   : > { %v3123_v38 = vpop.f32.mrf.mxu1 }
 0x373   : > { %3520 = vst [vmem:[%s6215_s9 + $0x80] sm:$0xff] %v3472_v56  ;;  %v3474_v17 = vmax.f32 %v3426_v24, 0.0  ;;  %v3427_v26 = vadd.f32 %v4614_v48, %v3379_v30  ;;  %v3381_v28 = vmax.f32 %v3122_v40, 0.0  ;;  %v3124_v46 = vadd.f32 %v3123_v38, %v3011_v54  ;;  %v3044_v24 = vpop.f32.mrf.mxu0  ;;  %v4621_v40 = vld [vmem:[%s4886_s14 + $0xf0] sm:$0xff] }
 0x374   : > { %v3127_v11 = vpop.f32.mrf.mxu1  ;;  %v3031_v56 = vadd.f32 %v6252_v53, %v6195_v43 }
 0x375   : > { %3522 = vst [vmem:[%s6215_s9 + $0x90] sm:$0xff] %v3474_v17  ;;  %v3475_v23 = vmax.f32 %v3427_v26, 0.0  ;;  %v3429_v7 = vadd.f32 %v4615_v21, %v3381_v28  ;;  %v3382_v39 = vmax.f32 %v3124_v46, 0.0  ;;  %v3128_v9 = vadd.f32 %v3127_v11, %v3015_v34  ;;  %v4622_v28 = vld [vmem:[%s4886_s14 + $0xf8] sm:$0xff]  ;;  %v3046_v21 = vpop.f32.mrf.mxu0 }
 0x376   : > { %v3129_v14 = vpop.f32.mrf.mxu1  ;;  %v3035_v17 = vadd.f32 %v6262_v3, %v6191_v58  ;;  %v3037_v11 = vadd.f32 %v6272_v27, %v6195_v43 }
 0x377   : > { %3523 = vst [vmem:[%s6215_s9 + $0x98] sm:$0xff] %v3475_v23  ;;  %v3477_v29 = vmax.f32 %v3429_v7, 0.0  ;;  %v3430_v60 = vadd.f32 %v4616_v2, %v3382_v39  ;;  %v3384_v6 = vmax.f32 %v3128_v9, 0.0  ;;  %v3130_v57 = vadd.f32 %v3129_v14, %v3017_v51  ;;  %v4623_v39 = vld [vmem:[%s4886_s14 + $0x108] sm:$0xff] }
 0x378   : > { %v3131_v45 = vpop.f32.mrf.mxu1  ;;  %v3039_v14 = vadd.f32 %v3038_v35, %v6191_v58 }
 0x379   : > { %3525 = vst [vmem:[%s6215_s9 + $0xa8] sm:$0xff] %v3477_v29  ;;  %v3478_v49 = vmax.f32 %v3430_v60, 0.0  ;;  %v3432_v42 = vadd.f32 %v4617_v47, %v3384_v6  ;;  %v3385_v18 = vmax.f32 %v3130_v57, 0.0  ;;  %v3132_v10 = vadd.f32 %v3131_v45, %v3019_v16  ;;  %v4624_v60 = vld [vmem:[%s4886_s14 + $0x110] sm:$0xff] }
 0x37a   : > { %v3133_v12 = vpop.f32.mrf.mxu1 }
 0x37b   : > { %3526 = vst [vmem:[%s6215_s9 + $0xb0] sm:$0xff] %v3478_v49  ;;  %v3480_v20 = vmax.f32 %v3432_v42, 0.0  ;;  %v3433_v63 = vadd.f32 %v4618_v59, %v3385_v18  ;;  %v3387_v55 = vmax.f32 %v3132_v10, 0.0  ;;  %v3134_v19 = vadd.f32 %v3133_v12, %v3021_v32  ;;  %v3048_v49 = vpop.f32.mrf.mxu0  ;;  %v4625_v42 = vld [vmem:[%s4886_s14 + $0x120] sm:$0xff]  ;;  %v4626_v59 = vld [vmem:[%s4886_s14 + $0x128] sm:$0xff] }
 0x37c   : > { %v3137_v1 = vpop.f32.mrf.mxu1  ;;  %v3041_v32 = vadd.f32 %v3040_v33, %v6195_v43 }
 0x37d   : > { %3528 = vst [vmem:[%s6215_s9 + $0xc0] sm:$0xff] %v3480_v20  ;;  %v3481_v61 = vmax.f32 %v3433_v63, 0.0  ;;  %v3435_v13 = vadd.f32 %v4619_v36, %v3387_v55  ;;  %v3388_v22 = vmax.f32 %v3134_v19, 0.0  ;;  %v3138_v62 = vadd.f32 %v3137_v1, %v3025_v25  ;;  %v3050_v33 = vpop.f32.mrf.mxu0  ;;  %v4627_v36 = vld [vmem:[%s4886_s14 + $0x138] sm:$0xff] }
 0x37e   : > { %v3139_v15 = vpop.f32.mrf.mxu1  ;;  %v3045_v25 = vadd.f32 %v3044_v24, %v6191_v58 }
 0x37f   : > { %3529 = vst [vmem:[%s6215_s9 + $0xc8] sm:$0xff] %v3481_v61  ;;  %v3483_v0 = vmax.f32 %v3435_v13, 0.0  ;;  %v3436_v54 = vadd.f32 %v4620_v4, %v3388_v22  ;;  %v3390_v52 = vmax.f32 %v3138_v62, 0.0  ;;  %v3140_v5 = vadd.f32 %v3139_v15, %v3027_v44  ;;  %v4628_v4 = vld [vmem:[%s4886_s14 + $0x140] sm:$0xff] }
 0x380   : > { %v3141_v37 = vpop.f32.mrf.mxu1  ;;  %v3047_v44 = vadd.f32 %v3046_v21, %v6195_v43  ;;  %v6332_v21 = vrot.slane %v6185_v41, %v5614_v8 }
 0x381   : > { %3531 = vst [vmem:[%s6215_s9 + $0xd8] sm:$0xff] %v3483_v0  ;;  %v3484_v30 = vmax.f32 %v3436_v54, 0.0  ;;  %v3438_v34 = vadd.f32 %v4621_v40, %v3390_v52  ;;  %v3391_v31 = vmax.f32 %v3140_v5, 0.0  ;;  %v3142_v38 = vadd.f32 %v3141_v37, %v3029_v50 }
 0x382   : > { %v3143_v48 = vpop.f32.mrf.mxu1  ;;  %v3049_v50 = vadd.f32 %v3048_v49, %v6191_v58 }
 0x383   : > { %3532 = vst [vmem:[%s6215_s9 + $0xe0] sm:$0xff] %v3484_v30  ;;  %v3486_v26 = vmax.f32 %v3438_v34, 0.0  ;;  %v3439_v46 = vadd.f32 %v4622_v28, %v3391_v31  ;;  %v3393_v53 = vmax.f32 %v3142_v38, 0.0  ;;  %v3144_v51 = vadd.f32 %v3143_v48, %v3031_v56  ;;  %v4629_v30 = vld [vmem:[%s4886_s14 + $0x150] sm:$0xff]  ;;  %v4241_v31 = vpop.f32.mrf.mxu0  ;;  %v4630_v48 = vld [vmem:[%s4886_s14 + $0x158] sm:$0xff] }
 0x384   : > { %v3147_v23 = vpop.f32.mrf.mxu1  ;;  %v3051_v56 = vadd.f32 %v3050_v33, %v6195_v43 }
 0x385   : > { %3534 = vst [vmem:[%s6215_s9 + $0xf0] sm:$0xff] %v3486_v26  ;;  %v3487_v7 = vmax.f32 %v3439_v46, 0.0  ;;  %v3441_v9 = vadd.f32 %v4623_v39, %v3393_v53  ;;  %v3394_v3 = vmax.f32 %v3144_v51, 0.0  ;;  %v3148_v16 = vadd.f32 %v3147_v23, %v3035_v17  ;;  %v4631_v51 = vld [vmem:[%s4886_s14 + $0x168] sm:$0xff] }
 0x386   : > { %v3149_v29 = vpop.f32.mrf.mxu1 }
 0x387   : > { %3535 = vst [vmem:[%s6215_s9 + $0xf8] sm:$0xff] %v3487_v7  ;;  %v3489_v2 = vmax.f32 %v3441_v9, 0.0  ;;  %v3442_v6 = vadd.f32 %v4624_v60, %v3394_v3  ;;  %v3396_v27 = vmax.f32 %v3148_v16, 0.0  ;;  %v3150_v57 = vadd.f32 %v3149_v29, %v3037_v11  ;;  %v3297_v7 = vpop.f32.mrf.mxu0  ;;  %v4632_v3 = vld [vmem:[%s4886_s14 + $0x170] sm:$0xff] }
 0x388   : > { %v3151_v45 = vpop.f32.mrf.mxu1 }
 0x389   : > { %3537 = vst [vmem:[%s6215_s9 + $0x108] sm:$0xff] %v3489_v2  ;;  %v3490_v47 = vmax.f32 %v3442_v6, 0.0  ;;  %v3444_v18 = vadd.f32 %v4625_v42, %v3396_v27  ;;  %v3397_v35 = vmax.f32 %v3150_v57, 0.0  ;;  %v3152_v10 = vadd.f32 %v3151_v45, %v3039_v14  ;;  %v4242_v6 = vpop.f32.mrf.mxu0  ;;  %v4633_v42 = vld [vmem:[%s4886_s14 + $0x10] sm:$0xff] }
 0x38a   : > { %v3153_v12 = vpop.f32.mrf.mxu1 }
 0x38b   : > { %3538 = vst [vmem:[%s6215_s9 + $0x110] sm:$0xff] %v3490_v47  ;;  %v3492_v20 = vmax.f32 %v3444_v18, 0.0  ;;  %v3445_v63 = vadd.f32 %v4626_v59, %v3397_v35  ;;  %v3399_v55 = vmax.f32 %v3152_v10, 0.0  ;;  %v3154_v19 = vadd.f32 %v3153_v12, %v3041_v32  ;;  %v3300_v49 = vpop.f32.mrf.mxu0 }
 0x38c   : > { %v3157_v1 = vpop.f32.mrf.mxu1 }
 0x38d   : > { %3540 = vst [vmem:[%s6215_s9 + $0x120] sm:$0xff] %v3492_v20  ;;  %v3493_v61 = vmax.f32 %v3445_v63, 0.0  ;;  %v3447_v13 = vadd.f32 %v4627_v36, %v3399_v55  ;;  %v3400_v22 = vmax.f32 %v3154_v19, 0.0  ;;  %v3158_v62 = vadd.f32 %v3157_v1, %v3045_v25  ;;  %v4245_v63 = vpop.f32.mrf.mxu0  ;;  %v4634_v19 = vld [vmem:[%s4886_s14 + $0x28] sm:$0xff] }
 0x38e   : > { %v3159_v15 = vpop.f32.mrf.mxu1 }
 0x38f   : > { %3541 = vst [vmem:[%s6215_s9 + $0x128] sm:$0xff] %v3493_v61  ;;  %v3495_v0 = vmax.f32 %v3447_v13, 0.0  ;;  %v3448_v54 = vadd.f32 %v4628_v4, %v3400_v22  ;;  %v3402_v52 = vmax.f32 %v3158_v62, 0.0  ;;  %v3160_v5 = vadd.f32 %v3159_v15, %v3047_v44  ;;  %v3313_v62 = vpop.f32.mrf.mxu0  ;;  %v4635_v15 = vld [vmem:[%s4886_s14 + $0x40] sm:$0xff] }
 0x390   : > { %v3161_v37 = vpop.f32.mrf.mxu1 }
 0x391   : > { %3543 = vst [vmem:[%s6215_s9 + $0x138] sm:$0xff] %v3495_v0  ;;  %v3496_v24 = vmax.f32 %v3448_v54, 0.0  ;;  %v3450_v40 = vadd.f32 %v4629_v30, %v3402_v52  ;;  %v3403_v34 = vmax.f32 %v3160_v5, 0.0  ;;  %v3162_v58 = vadd.f32 %v3161_v37, %v3049_v50 }
 0x392   : > { %v3163_v38 = vpop.f32.mrf.mxu1 }
 0x393   : > { %3544 = vst [vmem:[%s6215_s9 + $0x140] sm:$0xff] %v3496_v24  ;;  %v3498_v17 = vmax.f32 %v3450_v40, 0.0  ;;  %v3451_v26 = vadd.f32 %v4630_v48, %v3403_v34  ;;  %v3405_v28 = vmax.f32 %v3162_v58, 0.0  ;;  %v3164_v46 = vadd.f32 %v3163_v38, %v3051_v56  ;;  %v4246_v24 = vpop.f32.mrf.mxu0  ;;  %v4636_v40 = vld [vmem:[%s4886_s14 + $0x58] sm:$0xff] }
 0x394   : > { %v4095_v43 = vpop.f32.mrf.mxu1 }
 0x395   : > { %3546 = vst [vmem:[%s6215_s9 + $0x150] sm:$0xff] %v3498_v17  ;;  %v3499_v53 = vmax.f32 %v3451_v26, 0.0  ;;  %v3453_v11 = vadd.f32 %v4631_v51, %v3405_v28  ;;  %v3406_v23 = vmax.f32 %v3164_v46, 0.0  ;;  %v3316_v28 = vpop.f32.mrf.mxu0 }
 0x396   : > { %v4096_v39 = vpop.f32.mrf.mxu1 }
 0x397   : > { %3547 = vst [vmem:[%s6215_s9 + $0x158] sm:$0xff] %v3499_v53  ;;  %v3501_v9 = vmax.f32 %v3453_v11, 0.0  ;;  %v3454_v16 = vadd.f32 %v4632_v3, %v3406_v23  ;;  %v4097_v14 = vadd.f32 %v4096_v39, %v4095_v43  ;;  %v4637_v43 = vld [vmem:[%s4886_s14 + $0x70] sm:$0xff]  ;;  %v4249_v3 = vpop.f32.mrf.mxu0 }
 0x398   : > { %v4098_v29 = vpop.f32.mrf.mxu1 }
 0x399   : > { %3549 = vst [vmem:[%s6215_s9 + $0x168] sm:$0xff] %v3501_v9  ;;  %v3502_v2 = vmax.f32 %v3454_v16, 0.0  ;;  %v3201_v60 = vadd.f32 %v4097_v14, %v6332_v21  ;;  %v4638_v14 = vld [vmem:[%s4886_s14 + $0x88] sm:$0xff] }
 0x39a   : > { %v4099_v27 = vpop.f32.mrf.mxu1 }
 0x39b   : > { %3550 = vst [vmem:[%s6215_s9 + $0x170] sm:$0xff] %v3502_v2  ;;  %v3298_v57 = vadd.f32 %v3297_v7, %v3201_v60  ;;  %v4100_v32 = vadd.f32 %v4099_v27, %v4098_v29 }
 0x39c   : > { %v4101_v8 = vpop.f32.mrf.mxu1 }
 0x39d   : > { %v3362_v41 = vmax.f32 %v3298_v57, 0.0  ;;  %v3204_v45 = vadd.f32 %v4100_v32, %v6332_v21 }
 0x39e   : > { %v4102_v47 = vpop.f32.mrf.mxu1 }
 0x39f   : > { %v3410_v18 = vadd.f32 %v4633_v42, %v3362_v41  ;;  %v3301_v35 = vadd.f32 %v3300_v49, %v3204_v45  ;;  %v4103_v10 = vadd.f32 %v4102_v47, %v4101_v8  ;;  %v3329_v8 = vpop.f32.mrf.mxu0  ;;  %v4639_v45 = vld [vmem:[%s4886_s14 + $0xa0] sm:$0xff] }
 0x3a0   : > { %v4104_v25 = vpop.f32.mrf.mxu1 }
 0x3a1   : > { %v3458_v12 = vmax.f32 %v3410_v18, 0.0  ;;  %v3365_v20 = vmax.f32 %v3301_v35, 0.0  ;;  %v3209_v59 = vadd.f32 %v4103_v10, %v6332_v21 }
 0x3a2   : > { %v4105_v55 = vpop.f32.mrf.mxu1 }
 0x3a3   : > { %3506 = vst.msk [vmem:[%s6215_s9 + $0x10] sm:$0xff] %vm867_vm1, %v3458_v12  ;;  %v3413_v44 = vadd.f32 %v4634_v19, %v3365_v20  ;;  %v3306_v1 = vadd.f32 %v4241_v31, %v3209_v59  ;;  %v4106_v33 = vadd.f32 %v4105_v55, %v4104_v25  ;;  %v4250_v12 = vpop.f32.mrf.mxu0  ;;  %v4640_v59 = vld [vmem:[%s4886_s14 + $0xb8] sm:$0xff] }
 0x3a4   : > { %v4107_v61 = vpop.f32.mrf.mxu1 }
 0x3a5   : > { %v3461_v36 = vmax.f32 %v3413_v44, 0.0  ;;  %v3368_v13 = vmax.f32 %v3306_v1, 0.0  ;;  %v3212_v22 = vadd.f32 %v4106_v33, %v6332_v21 }
 0x3a6   : > { %v4108_v50 = vpop.f32.mrf.mxu1 }
 0x3a7   : > { %3509 = vst.msk [vmem:[%s6215_s9 + $0x28] sm:$0xff] %vm867_vm1, %v3461_v36  ;;  %v3416_v0 = vadd.f32 %v4635_v15, %v3368_v13  ;;  %v3309_v4 = vadd.f32 %v4242_v6, %v3212_v22  ;;  %v4109_v54 = vadd.f32 %v4108_v50, %v4107_v61  ;;  %v3332_v36 = vpop.f32.mrf.mxu0  ;;  %v4641_v22 = vld [vmem:[%s4886_s14 + $0xd0] sm:$0xff] }
 0x3a8   : > { %v4110_v52 = vpop.f32.mrf.mxu1 }
 0x3a9   : > { %v3464_v5 = vmax.f32 %v3416_v0, 0.0  ;;  %v3371_v56 = vmax.f32 %v3309_v4, 0.0  ;;  %v3217_v37 = vadd.f32 %v4109_v54, %v6332_v21 }
 0x3aa   : > { %v4111_v30 = vpop.f32.mrf.mxu1 }
 0x3ab   : > { %3512 = vst.msk [vmem:[%s6215_s9 + $0x40] sm:$0xff] %vm867_vm1, %v3464_v5  ;;  %v3419_v34 = vadd.f32 %v4636_v40, %v3371_v56  ;;  %v3314_v58 = vadd.f32 %v3313_v62, %v3217_v37  ;;  %v4112_v31 = vadd.f32 %v4111_v30, %v4110_v52  ;;  %v4253_v5 = vpop.f32.mrf.mxu0  ;;  %v4642_v37 = vld [vmem:[%s4886_s14 + $0xe8] sm:$0xff] }
 0x3ac   : > { %v4113_v38 = vpop.f32.mrf.mxu1 }
 0x3ad   : > { %v3467_v17 = vmax.f32 %v3419_v34, 0.0  ;;  %v3374_v48 = vmax.f32 %v3314_v58, 0.0  ;;  %v3220_v26 = vadd.f32 %v4112_v31, %v6332_v21 }
 0x3ae   : > { %v4114_v46 = vpop.f32.mrf.mxu1 }
 0x3af   : > { %3515 = vst.msk [vmem:[%s6215_s9 + $0x58] sm:$0xff] %vm867_vm1, %v3467_v17  ;;  %v3422_v53 = vadd.f32 %v4637_v43, %v3374_v48  ;;  %v3317_v51 = vadd.f32 %v3316_v28, %v3220_v26  ;;  %v4115_v11 = vadd.f32 %v4114_v46, %v4113_v38  ;;  %v3345_v17 = vpop.f32.mrf.mxu0  ;;  %v4643_v26 = vld [vmem:[%s4886_s14 + $0x100] sm:$0xff] }
 0x3b0   : > { %v4116_v23 = vpop.f32.mrf.mxu1 }
 0x3b1   : > { %v3470_v7 = vmax.f32 %v3422_v53, 0.0  ;;  %v3377_v39 = vmax.f32 %v3317_v51, 0.0  ;;  %v3225_v9 = vadd.f32 %v4115_v11, %v6332_v21 }
 0x3b2   : > { %v4117_v16 = vpop.f32.mrf.mxu1 }
 0x3b3   : > { %3518 = vst.msk [vmem:[%s6215_s9 + $0x70] sm:$0xff] %vm867_vm1, %v3470_v7  ;;  %v3425_v29 = vadd.f32 %v4638_v14, %v3377_v39  ;;  %v3322_v2 = vadd.f32 %v4245_v63, %v3225_v9  ;;  %v4118_v60 = vadd.f32 %v4117_v16, %v4116_v23  ;;  %v4254_v7 = vpop.f32.mrf.mxu0  ;;  %v4644_v9 = vld [vmem:[%s4886_s14 + $0x118] sm:$0xff] }
 0x3b4   : > { %v4119_v6 = vpop.f32.mrf.mxu1 }
 0x3b5   : > { %v3473_v27 = vmax.f32 %v3425_v29, 0.0  ;;  %v3380_v57 = vmax.f32 %v3322_v2, 0.0  ;;  %v3228_v32 = vadd.f32 %v4118_v60, %v6332_v21 }
 0x3b6   : > { %v4120_v41 = vpop.f32.mrf.mxu1 }
 0x3b7   : > { %3521 = vst.msk [vmem:[%s6215_s9 + $0x88] sm:$0xff] %vm867_vm1, %v3473_v27  ;;  %v3428_v49 = vadd.f32 %v4639_v45, %v3380_v57  ;;  %v3325_v47 = vadd.f32 %v4246_v24, %v3228_v32  ;;  %v4121_v42 = vadd.f32 %v4120_v41, %v4119_v6  ;;  %v3348_v27 = vpop.f32.mrf.mxu0  ;;  %v4645_v32 = vld [vmem:[%s4886_s14 + $0x130] sm:$0xff] }
 0x3b8   : > { %v4122_v18 = vpop.f32.mrf.mxu1 }
 0x3b9   : > { %v3476_v35 = vmax.f32 %v3428_v49, 0.0  ;;  %v3383_v10 = vmax.f32 %v3325_v47, 0.0  ;;  %v3233_v25 = vadd.f32 %v4121_v42, %v6332_v21 }
 0x3ba   : > { %v4123_v20 = vpop.f32.mrf.mxu1 }
 0x3bb   : > { %3524 = vst.msk [vmem:[%s6215_s9 + $0xa0] sm:$0xff] %vm867_vm1, %v3476_v35  ;;  %v3431_v63 = vadd.f32 %v4640_v59, %v3383_v10  ;;  %v3330_v55 = vadd.f32 %v3329_v8, %v3233_v25  ;;  %v4124_v19 = vadd.f32 %v4123_v20, %v4122_v18  ;;  %v4646_v10 = vld [vmem:[%s4886_s14 + $0x148] sm:$0xff] }
 0x3bc   : > { %v4125_v44 = vpop.f32.mrf.mxu1 }
 0x3bd   : > { %v3479_v1 = vmax.f32 %v3431_v63, 0.0  ;;  %v3386_v33 = vmax.f32 %v3330_v55, 0.0  ;;  %v3236_v61 = vadd.f32 %v4124_v19, %v6332_v21  ;;  %v4647_v19 = vld [vmem:[%s4886_s14 + $0x160] sm:$0xff] }
 0x3be   : > { %v4126_v13 = vpop.f32.mrf.mxu1 }
 0x3bf   : > { %3527 = vst.msk [vmem:[%s6215_s9 + $0xb8] sm:$0xff] %vm867_vm1, %v3479_v1  ;;  %v3434_v62 = vadd.f32 %v4641_v22, %v3386_v33  ;;  %v3333_v50 = vadd.f32 %v3332_v36, %v3236_v61  ;;  %v4127_v15 = vadd.f32 %v4126_v13, %v4125_v44  ;;  %v4648_v36 = vld [vmem:[%s4886_s14 + $0x178] sm:$0xff]  ;;  %s4747_s14 = smov [#allocation5]  }
 0x3c0   : > { %v4128_v0 = vpop.f32.mrf.mxu1  ;;  %s4681_s16 = sshll.u32 %s4747_s14, 4  ;;  %s4682_s16 = int_to_ptr.vmem [resolvable:$false] %s4681_s16 }
 0x3c1   : > { %v3482_v4 = vmax.f32 %v3434_v62, 0.0  ;;  %v3389_v54 = vmax.f32 %v3333_v50, 0.0  ;;  %v3241_v52 = vadd.f32 %v4127_v15, %v6332_v21  ;;  %s4683_s21 = scalar_lea.vmem %s4682_s16, 12288  ;;  %p4684_p5 = scmp.lt.s32.totalorder %s6407_s18, %s4682_s16 }
 0x3c2   : > { %v4129_v56 = vpop.f32.mrf.mxu1  ;;  %p4685_p7 = scmp.lt.s32.totalorder %s4683_s21, %s4677_s23 }
 0x3c3   : > { %3530 = vst.msk [vmem:[%s6215_s9 + $0xd0] sm:$0xff] %vm867_vm1, %v3482_v4  ;;  %v3437_v24 = vadd.f32 %v4642_v37, %v3389_v54  ;;  %v3338_v30 = vadd.f32 %v4249_v3, %v3241_v52  ;;  %v4130_v40 = vadd.f32 %v4129_v56, %v4128_v0 }
 0x3c4   : > { %v4131_v34 = vpop.f32.mrf.mxu1  ;;  %p4686_p8 = por %p4685_p7, %p4684_p5 }
 0x3c5   : > { %v3485_v58 = vmax.f32 %v3437_v24, 0.0  ;;  %v3392_v31 = vmax.f32 %v3338_v30, 0.0  ;;  %v3244_v38 = vadd.f32 %v4130_v40, %v6332_v21 }
 0x3c6   : > { %v4132_v48 = vpop.f32.mrf.mxu1  ;;  %p4687_p9 = pnand %p4686_p8, %p4680_p4 }
 0x3c7   : > { %3533 = vst.msk [vmem:[%s6215_s9 + $0xe8] sm:$0xff] %vm867_vm1, %v3485_v58  ;;  %v3440_v28 = vadd.f32 %v4643_v26, %v3392_v31  ;;  %v3341_v46 = vadd.f32 %v4250_v12, %v3244_v38  ;;  %v4133_v43 = vadd.f32 %v4132_v48, %v4131_v34 }
 0x3c8   : > { %v4134_v53 = vpop.f32.mrf.mxu1 }
 0x3c9   : > { %v3488_v51 = vmax.f32 %v3440_v28, 0.0  ;;  %v3395_v11 = vmax.f32 %v3341_v46, 0.0  ;;  %v3249_v23 = vadd.f32 %v4133_v43, %v6332_v21 }
 0x3ca   : > { %v4135_v39 = vpop.f32.mrf.mxu1 }
 0x3cb   : > { %3536 = vst.msk [vmem:[%s6215_s9 + $0x100] sm:$0xff] %vm867_vm1, %v3488_v51  ;;  %v3443_v3 = vadd.f32 %v4644_v9, %v3395_v11  ;;  %v3346_v16 = vadd.f32 %v3345_v17, %v3249_v23  ;;  %v4136_v14 = vadd.f32 %v4135_v39, %v4134_v53 }
 0x3cc   : > { %v4137_v29 = vpop.f32.mrf.mxu1 }
 0x3cd   : > { %v3491_v2 = vmax.f32 %v3443_v3, 0.0  ;;  %v3398_v60 = vmax.f32 %v3346_v16, 0.0  ;;  %v3252_v6 = vadd.f32 %v4136_v14, %v6332_v21 }
 0x3ce   : > { %v4138_v57 = vpop.f32.mrf.mxu1 }
 0x3cf   : > { %3539 = vst.msk [vmem:[%s6215_s9 + $0x118] sm:$0xff] %vm867_vm1, %v3491_v2  ;;  %v3446_v8 = vadd.f32 %v4645_v32, %v3398_v60  ;;  %v3349_v41 = vadd.f32 %v3348_v27, %v3252_v6  ;;  %v4139_v45 = vadd.f32 %v4138_v57, %v4137_v29 }
 0x3d0   : > { %v4140_v49 = vpop.f32.mrf.mxu1 }
 0x3d1   : > { %v3494_v47 = vmax.f32 %v3446_v8, 0.0  ;;  %v3401_v42 = vmax.f32 %v3349_v41, 0.0  ;;  %v3257_v18 = vadd.f32 %v4139_v45, %v6332_v21 }
 0x3d2   : > { %v4141_v35 = vpop.f32.mrf.mxu1 }
 0x3d3   : > { %3542 = vst.msk [vmem:[%s6215_s9 + $0x130] sm:$0xff] %vm867_vm1, %v3494_v47  ;;  %v3449_v25 = vadd.f32 %v4646_v10, %v3401_v42  ;;  %v3354_v12 = vadd.f32 %v4253_v5, %v3257_v18  ;;  %v4142_v20 = vadd.f32 %v4141_v35, %v4140_v49 }
 0x3d5   : > { %v3497_v59 = vmax.f32 %v3449_v25, 0.0  ;;  %v3404_v63 = vmax.f32 %v3354_v12, 0.0  ;;  %v3260_v55 = vadd.f32 %v4142_v20, %v6332_v21 }
 0x3d7   : > { %3545 = vst.msk [vmem:[%s6215_s9 + $0x148] sm:$0xff] %vm867_vm1, %v3497_v59  ;;  %v3452_v44 = vadd.f32 %v4647_v19, %v3404_v63  ;;  %v3357_v1 = vadd.f32 %v4254_v7, %v3260_v55 }
 0x3d9   : > { %v3500_v33 = vmax.f32 %v3452_v44, 0.0  ;;  %v3407_v61 = vmax.f32 %v3357_v1, 0.0 }
 0x3db   : > { %3548 = vst.msk [vmem:[%s6215_s9 + $0x160] sm:$0xff] %vm867_vm1, %v3500_v33  ;;  %v3455_v13 = vadd.f32 %v4648_v36, %v3407_v61 }
 0x3dd   : > { %v3503_v21 = vmax.f32 %v3455_v13, 0.0 }
 0x3df   : > { %3551 = vst.msk [vmem:[%s6215_s9 + $0x178] sm:$0xff] %vm867_vm1, %v3503_v21 }
 0x3e0   : > { %4690 = shalt.err (!%p4687_p9)
}
 0x3e1   : > { %s4691_s8 = scalar_lea.hbm %s6405_s22, 6144  ;;  %s4695_s9 = scalar_lea.hbm %s6458_s7, 24576 }
 0x3e2   : > { %p4692_p13 = scmp.ne.s32.totalorder %s6405_s22, %s4691_s8  ;;  %p4696_p2 = scmp.lt.s32.totalorder %s6405_s22, %s6458_s7 }
 0x3e3   : > { %p4697_p3 = scmp.lt.s32.totalorder %s4695_s9, %s4691_s8 }
 0x3e4   : > { %p4693_p1 = pnand %p4692_p13, %p6466_p11 }
 0x3e5   : > { %p4698_p6 = por %p4697_p3, %p4696_p2 }
 0x3e6   : > { %p4694_p0 = pneg %p4693_p1 }
 0x3e8   : > { %p4699_p10 = pnand %p4698_p6, %p4694_p0 }
 0x3ea   : > { %4702 = shalt.err (!%p4699_p10)
}
 0x3eb   : > { %s4748_s20 = smov 384   ;;  %s4749_s23 = smov 24  }
 0x3ec   : > { %4264 = dma.vmem_to_hbm [thread:$0]  (%p6466_p11), %s6407_s18, 6144, %s6405_s22, %s3553_s28, %s4748_s20, %s4748_s20, %s4749_s23  }
 0x3ed PF: > { %p4275_p12 = scmp.ge.s32.totalorder %s4741_s27, 2  ;;  %s3582_s14 = sand.u32 1, %s4729_s24  }
 0x3ee   : > { %p6467_p4 = scmp.ne.s32.totalorder %s6463_s13, 0  ;;  %s3583_s16 = scalar_lea.sflag [#allocation4], %s3582_s14 }
 0x3f0   : > { %p4271_p5 = pnand %p4275_p12, %p6467_p4 }
 0x3f2   : > { %p4272_p7 = pneg %p4271_p5 }
 0x3f4   : > { %4724 = dma.done.wait (%p4272_p7), %s3583_s16, 6144  }
 0x3f5   : > { %4726 = vsyncadd (%p4272_p7), %s3583_s16, 4294961152  ;;  %p20_p8 = scmp.ge.s32.totalorder %s4815_s30, 6   ;;  %s6468_s24 = smov %s4733_s25 }
 0x3f6   : > { %s6469_s25 = smov %s4737_s26  ;;  %s6470_s26 = smov %s4827_s10 }
 0x3f7   : > { %s6471_s27 = smov %s4815_s30  ;;  %22 = sbr.rel (!%p20_p8) target bundleno = 5 (0x5), region = 93 }
 0x3fc   :  { %3588 = vsyncpa [#allocation3], 1 }
 0x3fd   :  { %3590 = vsyncpa [#allocation3 + $0x1], 1 }
 0x3fe   :  { %3591 = vsyncpa [#allocation4], 1 }
 0x3ff   :  { %3593 = vsyncpa [#allocation4 + $0x1], 1 }

</bundles_post_ra>
